<compile_context>
chip_gen: v7x
topology: tpu7x:2x2x1
jax: 0.10.0
libtpu: 0.0.40
codegen_flags: <defaults>
</compile_context>

<pallas_src>
import math

import jax
import jax.numpy as jnp
from jax import lax
from jax.experimental import pallas as pl
from jax.experimental.pallas import tpu as pltpu

# ---------------- synthetic module configuration (small shapes) ----------------
B = 2            # batch
T = 32           # time frames
RES_DIM = 16     # residual_dim
GATE_DIM = 16    # gate_dim
SKIP_DIM = 32    # skip_dim
K = 3            # kernel_size
DILATIONS = (1, 2)       # dilation_list, n_stages = 1
U = len(DILATIONS)       # number of GatedActivationUnits
BN_EPS = 1e-5

P1 = (K - 1) // 2        # center tap index ('same' padding, odd K assumed)
SQRT_HALF = math.sqrt(0.5)
OUT_SCALE = math.sqrt(1.0 / U)
M = B * T                # matmul M dimension (batch folded in)


# ------------------------------- Pallas kernel ---------------------------------
def wavenet_kernel(x_ref, win_ref, bin_ref, wsr_ref, bsr_ref, out_ref):
    # x_ref   : (M, RES_DIM)                       f32 input activations (M = B*T)
    # win_ref : (U*K, RES_DIM, 2*GATE_DIM)         bf16 per-tap BN-folded in_layer weights
    # bin_ref : (U, 1, 2*GATE_DIM)                 f32
    # wsr_ref : (U*K, GATE_DIM, SKIP_DIM+RES_DIM)  bf16 per-tap fused skip|res weights
    # bsr_ref : (U, 1, SKIP_DIM+RES_DIM)           f32
    # out_ref : (M, SKIP_DIM)

    # Row -> within-batch time index; hoisted once (broadcasts are not CSE'd).
    t_idx = lax.broadcasted_iota(jnp.int32, (M, 1), 0) % T

    # Per-offset validity masks for 'same' zero padding, computed once.  Masking
    # is per batch, so sublane rolls on the flattened (M, C) view never leak
    # across the batch boundary.
    needed = {(k - P1) * d for d in DILATIONS for k in range(K)}
    needed |= {k - P1 for k in range(K)}
    masks = {o: (t_idx + o >= 0) & (t_idx + o < T) for o in sorted(needed) if o != 0}

    def tap(x, o):
        # x[b, t + o, :] with zeros outside [0, T): XLU sublane roll + mask,
        # no VMEM round-trip.
        if o == 0:
            return x
        rolled = pltpu.roll(x, (-o) % M, 0)
        return jnp.where(masks[o], rolled, 0.0)

    def conv_taps(x, w_ref, base, offsets, bias):
        # K accumulated (M, Cin) @ (Cin, Cout) bf16 matmuls, f32 accumulation
        # (no im2col lane-axis concatenate).
        acc = None
        for k, o in enumerate(offsets):
            y = jnp.dot(tap(x, o).astype(jnp.bfloat16), w_ref[base + k],
                        preferred_element_type=jnp.float32)
            acc = y if acc is None else acc + y
        return acc + bias

    # Loop-carried accumulators live in vregs (no VMEM scratch round-trips).
    xres = x_ref[...].astype(jnp.float32)            # (M, RES_DIM)
    skip = jnp.zeros((M, SKIP_DIM), jnp.float32)     # (M, SKIP_DIM)

    # Static unroll over units (U is small; see TODO above for production U).
    for u, d in enumerate(DILATIONS):
        # in_layer: dilated conv RES_DIM -> 2*GATE_DIM
        a = conv_taps(xres, win_ref, u * K,
                      [(k - P1) * d for k in range(K)], bin_ref[u])

        # gated activation unit (f32 elementwise/EUP; bf16 gate is an option on
        # v6e/v7x if tolerance allows — kept f32 to match the reference exactly).
        g = jnp.tanh(a[:, :GATE_DIM]) * jax.nn.sigmoid(a[:, GATE_DIM:])

        # skip & res convs (dilation 1) fused along Cout.
        sr = conv_taps(g, wsr_ref, u * K,
                       [k - P1 for k in range(K)], bsr_ref[u])

        skip = skip + sr[:, :SKIP_DIM]
        xres = (xres + sr[:, SKIP_DIM:]) * SQRT_HALF

    out_ref[...] = (skip * OUT_SCALE).astype(out_ref.dtype)


def wavenet_pallas(x_btc, win, bin_, wsr, bsr):
    """x_btc: (B, T, RES_DIM) f32 -> (B, T, SKIP_DIM) f32."""
    x_mc = x_btc.reshape(M, RES_DIM)                 # free contiguous reshape in XLA
    full = lambda a: pl.BlockSpec(a.shape, lambda i: (0,) * a.ndim)
    grid_spec = pltpu.PrefetchScalarGridSpec(
        num_scalar_prefetch=0,
        grid=(1,),                                   # batch folded into the matmul M dim
        in_specs=[full(x_mc), full(win), full(bin_), full(wsr), full(bsr)],
        out_specs=pl.BlockSpec((M, SKIP_DIM), lambda i: (0, 0)),
    )
    out_mc = pl.pallas_call(
        wavenet_kernel,
        grid_spec=grid_spec,
        out_shape=jax.ShapeDtypeStruct((M, SKIP_DIM), jnp.float32),
        compiler_params=pltpu.CompilerParams(
            dimension_semantics=("arbitrary",),
            # explicit VMEM budget (v7x: 64 MiB physical / 32 MiB scoped default)
            vmem_limit_bytes=32 * 1024 * 1024),
    )(x_mc, win, bin_, wsr, bsr)
    return out_mc.reshape(B, T, SKIP_DIM)            # free contiguous reshape in XLA


# ------------------------ parameter init + BN folding (glue) -------------------
def init_params(key):
    """Create per-unit conv + BN params (PyTorch layouts), deterministic."""
    def conv_bn(key, cout, cin, ksz):
        k1, k2, k3, k4, k5, k6 = jax.random.split(key, 6)
        w = 0.1 * jax.random.normal(k1, (cout, cin, ksz), jnp.float32)   # OIK
        b = 0.1 * jax.random.normal(k2, (cout,), jnp.float32)
        gamma = 1.0 + 0.1 * jax.random.normal(k3, (cout,), jnp.float32)
        beta = 0.1 * jax.random.normal(k4, (cout,), jnp.float32)
        mean = 0.1 * jax.random.normal(k5, (cout,), jnp.float32)
        var = 1.0 + 0.05 * jnp.abs(jax.random.normal(k6, (cout,), jnp.float32))
        return dict(w=w, b=b, gamma=gamma, beta=beta, mean=mean, var=var)

    units = []
    for _ in range(U):
        key, k_in, k_sk, k_rs = jax.random.split(key, 4)
        units.append(dict(
            in_layer=conv_bn(k_in, 2 * GATE_DIM, RES_DIM, K),
            skip_layer=conv_bn(k_sk, SKIP_DIM, GATE_DIM, K),
            res_layer=conv_bn(k_rs, RES_DIM, GATE_DIM, K),
        ))
    return units


def fold_bn(p):
    """Fold eval-mode BatchNorm into conv weight/bias. Returns (w_OIK, b_O)."""
    scale = p["gamma"] / jnp.sqrt(p["var"] + BN_EPS)
    w = p["w"] * scale[:, None, None]
    b = (p["b"] - p["mean"]) * scale + p["beta"]
    return w, b


def pack_for_kernel(units):
    """Stack BN-folded weights per unit, per tap (K, Cin, Cout), bf16 operands."""
    win_l, bin_l, wsr_l, bsr_l = [], [], [], []
    for up in units:
        w_in, b_in = fold_bn(up["in_layer"])                 # (2G, R, K)
        win_l.append(jnp.transpose(w_in, (2, 1, 0)))          # (K, R, 2G)
        bin_l.append(b_in[None, :])

        w_sk, b_sk = fold_bn(up["skip_layer"])               # (S, G, K)
        w_rs, b_rs = fold_bn(up["res_layer"])                # (R, G, K)
        w_cat = jnp.concatenate([w_sk, w_rs], axis=0)        # (S+R, G, K)
        b_cat = jnp.concatenate([b_sk, b_rs], axis=0)        # (S+R,)
        wsr_l.append(jnp.transpose(w_cat, (2, 1, 0)))         # (K, G, S+R)
        bsr_l.append(b_cat[None, :])

    win = jnp.concatenate(win_l, 0).astype(jnp.bfloat16)     # (U*K, R, 2G)
    bin_ = jnp.stack(bin_l, 0)                                # (U, 1, 2G) f32
    wsr = jnp.concatenate(wsr_l, 0).astype(jnp.bfloat16)     # (U*K, G, S+R)
    bsr = jnp.stack(bsr_l, 0)                                 # (U, 1, S+R) f32
    return win, bin_, wsr, bsr


# ------------------------------ pure-JAX reference ------------------------------
# Reference matches the kernel's arithmetic: bf16 conv operands, f32 accumulation,
# f32 gating / residual math.
def conv1d_same(x_bct, w_oik, b_o, dilation):
    pad = ((w_oik.shape[2] - 1) // 2) * dilation
    y = lax.conv_general_dilated(
        x_bct.astype(jnp.bfloat16), w_oik.astype(jnp.bfloat16),
        window_strides=(1,), padding=[(pad, pad)],
        rhs_dilation=(dilation,), dimension_numbers=("NCH", "OIH", "NCH"),
        preferred_element_type=jnp.float32)
    return y + b_o[None, :, None]


def wavenet_ref(x_bct, units):
    skip = jnp.zeros((B, SKIP_DIM, T), jnp.float32)
    for u, d in enumerate(DILATIONS):
        w_in, b_in = fold_bn(units[u]["in_layer"])
        w_sk, b_sk = fold_bn(units[u]["skip_layer"])
        w_rs, b_rs = fold_bn(units[u]["res_layer"])
        a = conv1d_same(x_bct, w_in, b_in, d)
        g = jnp.tanh(a[:, :GATE_DIM]) * jax.nn.sigmoid(a[:, GATE_DIM:])
        skip = skip + conv1d_same(g, w_sk, b_sk, 1)
        res = conv1d_same(g, w_rs, b_rs, 1)
        x_bct = (x_bct + res) * SQRT_HALF
    return skip * OUT_SCALE


# ------------------------------------ main --------------------------------------
if __name__ == "__main__":
    key = jax.random.PRNGKey(0)
    key, kx, kp = jax.random.split(key, 3)

    x_bct = jax.random.normal(kx, (B, RES_DIM, T), jnp.float32)   # PyTorch NCT layout
    units = init_params(kp)
    win, bin_, wsr, bsr = pack_for_kernel(units)

    # kernel layout: (B, T, C) -> flattened (B*T, C) inside the wrapper
    x_btc = jnp.transpose(x_bct, (0, 2, 1))
    out_btc = jax.block_until_ready(wavenet_pallas(x_btc, win, bin_, wsr, bsr))
    out_bct = jnp.transpose(out_btc, (0, 2, 1))                   # back to (B, skip_dim, T)

    ref_bct = jax.block_until_ready(wavenet_ref(x_bct, units))

    assert out_bct.shape == (B, SKIP_DIM, T)
    err = float(jnp.max(jnp.abs(out_bct - ref_bct)))
    assert err < 5e-3, f"max abs error {err}"
    print("KERNEL_OK")
</pallas_src>

<mosaic_0001>
module attributes {stable_mosaic.version = 11 : i64} {
  func.func @wavenet_kernel(%arg0: i32, %arg1: memref<64x16xf32, #tpu.memory_space<vmem>>, %arg2: memref<6x16x32xbf16, #tpu.memory_space<vmem>>, %arg3: memref<2x1x32xf32, #tpu.memory_space<vmem>>, %arg4: memref<6x16x48xbf16, #tpu.memory_space<vmem>>, %arg5: memref<2x1x48xf32, #tpu.memory_space<vmem>>, %arg6: memref<64x32xf32, #tpu.memory_space<vmem>>) attributes {dimension_semantics = [#tpu.dimension_semantics<arbitrary>], iteration_bounds = array<i64: 1>, scalar_prefetch = 0 : i64, scratch_operands = 0 : i64, tpu.core_type = #tpu.core_type<tc>, window_params = [{pipeline_mode = #tpu.pipeline_mode<synchronous>, transform_indices = @transform_0, window_bounds = array<i64: 64, 16>}, {pipeline_mode = #tpu.pipeline_mode<synchronous>, transform_indices = @transform_1, window_bounds = array<i64: 6, 16, 32>}, {pipeline_mode = #tpu.pipeline_mode<synchronous>, transform_indices = @transform_2, window_bounds = array<i64: 2, 1, 32>}, {pipeline_mode = #tpu.pipeline_mode<synchronous>, transform_indices = @transform_3, window_bounds = array<i64: 6, 16, 48>}, {pipeline_mode = #tpu.pipeline_mode<synchronous>, transform_indices = @transform_4, window_bounds = array<i64: 2, 1, 48>}, {pipeline_mode = #tpu.pipeline_mode<synchronous>, transform_indices = @transform_5, window_bounds = array<i64: 64, 32>}]} {
    %0 = tpu.iota {dimensions = array<i32: 0>} : vector<64x1xi32>
    %c32_i32 = arith.constant 32 : i32
    %c0_i32 = arith.constant 0 : i32
    %1 = arith.cmpi eq, %c32_i32, %c0_i32 : i32
    %c1_i32 = arith.constant 1 : i32
    %2 = arith.select %1, %c1_i32, %c32_i32 : i32
    %3 = vector.broadcast %2 : i32 to vector<64x1xi32>
    %4 = arith.remsi %0, %3 : vector<64x1xi32>
    %c0_i32_0 = arith.constant 0 : i32
    %5 = vector.broadcast %c0_i32_0 : i32 to vector<64x1xi32>
    %6 = arith.cmpi ne, %4, %5 : vector<64x1xi32>
    %c0_i32_1 = arith.constant 0 : i32
    %7 = vector.broadcast %c0_i32_1 : i32 to vector<64x1xi32>
    %8 = arith.cmpi slt, %4, %7 : vector<64x1xi32>
    %c0_i32_2 = arith.constant 0 : i32
    %9 = arith.cmpi slt, %2, %c0_i32_2 : i32
    %10 = vector.broadcast %9 : i1 to vector<64x1xi1>
    %11 = vector.broadcast %10 : vector<64x1xi1> to vector<64x1xi1>
    %12 = arith.xori %8, %11 : vector<64x1xi1>
    %13 = arith.andi %12, %6 : vector<64x1xi1>
    %14 = vector.broadcast %2 : i32 to vector<64x1xi32>
    %15 = arith.addi %4, %14 : vector<64x1xi32>
    %16 = arith.select %13, %15, %4 : vector<64x1xi1>, vector<64x1xi32>
    %c-2_i32 = arith.constant -2 : i32
    %17 = vector.broadcast %c-2_i32 : i32 to vector<64x1xi32>
    %18 = arith.addi %16, %17 : vector<64x1xi32>
    %c0_i32_3 = arith.constant 0 : i32
    %19 = vector.broadcast %c0_i32_3 : i32 to vector<64x1xi32>
    %20 = arith.cmpi sge, %18, %19 : vector<64x1xi32>
    %c-2_i32_4 = arith.constant -2 : i32
    %21 = vector.broadcast %c-2_i32_4 : i32 to vector<64x1xi32>
    %22 = arith.addi %16, %21 : vector<64x1xi32>
    %c32_i32_5 = arith.constant 32 : i32
    %23 = vector.broadcast %c32_i32_5 : i32 to vector<64x1xi32>
    %24 = arith.cmpi slt, %22, %23 : vector<64x1xi32>
    %25 = arith.andi %20, %24 : vector<64x1xi1>
    %c-1_i32 = arith.constant -1 : i32
    %26 = vector.broadcast %c-1_i32 : i32 to vector<64x1xi32>
    %27 = arith.addi %16, %26 : vector<64x1xi32>
    %c0_i32_6 = arith.constant 0 : i32
    %28 = vector.broadcast %c0_i32_6 : i32 to vector<64x1xi32>
    %29 = arith.cmpi sge, %27, %28 : vector<64x1xi32>
    %c-1_i32_7 = arith.constant -1 : i32
    %30 = vector.broadcast %c-1_i32_7 : i32 to vector<64x1xi32>
    %31 = arith.addi %16, %30 : vector<64x1xi32>
    %c32_i32_8 = arith.constant 32 : i32
    %32 = vector.broadcast %c32_i32_8 : i32 to vector<64x1xi32>
    %33 = arith.cmpi slt, %31, %32 : vector<64x1xi32>
    %34 = arith.andi %29, %33 : vector<64x1xi1>
    %c1_i32_9 = arith.constant 1 : i32
    %35 = vector.broadcast %c1_i32_9 : i32 to vector<64x1xi32>
    %36 = arith.addi %16, %35 : vector<64x1xi32>
    %c0_i32_10 = arith.constant 0 : i32
    %37 = vector.broadcast %c0_i32_10 : i32 to vector<64x1xi32>
    %38 = arith.cmpi sge, %36, %37 : vector<64x1xi32>
    %c1_i32_11 = arith.constant 1 : i32
    %39 = vector.broadcast %c1_i32_11 : i32 to vector<64x1xi32>
    %40 = arith.addi %16, %39 : vector<64x1xi32>
    %c32_i32_12 = arith.constant 32 : i32
    %41 = vector.broadcast %c32_i32_12 : i32 to vector<64x1xi32>
    %42 = arith.cmpi slt, %40, %41 : vector<64x1xi32>
    %43 = arith.andi %38, %42 : vector<64x1xi1>
    %c2_i32 = arith.constant 2 : i32
    %44 = vector.broadcast %c2_i32 : i32 to vector<64x1xi32>
    %45 = arith.addi %16, %44 : vector<64x1xi32>
    %c0_i32_13 = arith.constant 0 : i32
    %46 = vector.broadcast %c0_i32_13 : i32 to vector<64x1xi32>
    %47 = arith.cmpi sge, %45, %46 : vector<64x1xi32>
    %c2_i32_14 = arith.constant 2 : i32
    %48 = vector.broadcast %c2_i32_14 : i32 to vector<64x1xi32>
    %49 = arith.addi %16, %48 : vector<64x1xi32>
    %c32_i32_15 = arith.constant 32 : i32
    %50 = vector.broadcast %c32_i32_15 : i32 to vector<64x1xi32>
    %51 = arith.cmpi slt, %49, %50 : vector<64x1xi32>
    %52 = arith.andi %47, %51 : vector<64x1xi1>
    %c0 = arith.constant 0 : index
    %c0_16 = arith.constant 0 : index
    %53 = vector.load %arg1[%c0, %c0_16] : memref<64x16xf32, #tpu.memory_space<vmem>>, vector<64x16xf32>
    %cst = arith.constant 0.000000e+00 : f32
    %54 = vector.broadcast %cst : f32 to vector<64x32xf32>
    %c0_17 = arith.constant 0 : index
    %c0_18 = arith.constant 0 : index
    %c0_19 = arith.constant 0 : index
    %55 = vector.load %arg3[%c0_17, %c0_18, %c0_19] : memref<2x1x32xf32, #tpu.memory_space<vmem>>, vector<1x1x32xf32>
    %56 = vector.shape_cast %55 : vector<1x1x32xf32> to vector<1x32xf32>
    %c1_i32_20 = arith.constant 1 : i32
    %57 = tpu.dynamic_rotate %53 by %c1_i32_20 dim 0 : vector<64x16xf32>, i32 -> vector<64x16xf32>
    %cst_21 = arith.constant 0.000000e+00 : f32
    %58 = vector.shape_cast %34 : vector<64x1xi1> to vector<64x1xi1>
    %59 = vector.broadcast %58 : vector<64x1xi1> to vector<64x16xi1>
    %60 = vector.broadcast %cst_21 : f32 to vector<64x16xf32>
    %61 = arith.select %59, %57, %60 : vector<64x16xi1>, vector<64x16xf32>
    %62 = arith.truncf %61 : vector<64x16xf32> to vector<64x16xbf16>
    %c0_22 = arith.constant 0 : index
    %c0_23 = arith.constant 0 : index
    %c0_24 = arith.constant 0 : index
    %63 = vector.load %arg2[%c0_22, %c0_23, %c0_24] : memref<6x16x32xbf16, #tpu.memory_space<vmem>>, vector<1x16x32xbf16>
    %64 = vector.shape_cast %63 : vector<1x16x32xbf16> to vector<16x32xbf16>
    %cst_25 = arith.constant dense<0.000000e+00> : vector<64x32xf32>
    %65 = tpu.matmul %62, %64, %cst_25 {dimension_numbers = #tpu.dot_dimension_numbers<[1], [0], [0], [1], [0, 0, 1, 1], [], []>} : vector<64x16xbf16>, vector<16x32xbf16>, vector<64x32xf32> -> vector<64x32xf32>
    %66 = arith.truncf %53 : vector<64x16xf32> to vector<64x16xbf16>
    %c1 = arith.constant 1 : index
    %c0_26 = arith.constant 0 : index
    %c0_27 = arith.constant 0 : index
    %67 = vector.load %arg2[%c1, %c0_26, %c0_27] : memref<6x16x32xbf16, #tpu.memory_space<vmem>>, vector<1x16x32xbf16>
    %68 = vector.shape_cast %67 : vector<1x16x32xbf16> to vector<16x32xbf16>
    %cst_28 = arith.constant dense<0.000000e+00> : vector<64x32xf32>
    %69 = tpu.matmul %66, %68, %cst_28 {dimension_numbers = #tpu.dot_dimension_numbers<[1], [0], [0], [1], [0, 0, 1, 1], [], []>} : vector<64x16xbf16>, vector<16x32xbf16>, vector<64x32xf32> -> vector<64x32xf32>
    %70 = arith.addf %65, %69 : vector<64x32xf32>
    %c63_i32 = arith.constant 63 : i32
    %71 = tpu.dynamic_rotate %53 by %c63_i32 dim 0 : vector<64x16xf32>, i32 -> vector<64x16xf32>
    %cst_29 = arith.constant 0.000000e+00 : f32
    %72 = vector.shape_cast %43 : vector<64x1xi1> to vector<64x1xi1>
    %73 = vector.broadcast %72 : vector<64x1xi1> to vector<64x16xi1>
    %74 = vector.broadcast %cst_29 : f32 to vector<64x16xf32>
    %75 = arith.select %73, %71, %74 : vector<64x16xi1>, vector<64x16xf32>
    %76 = arith.truncf %75 : vector<64x16xf32> to vector<64x16xbf16>
    %c2 = arith.constant 2 : index
    %c0_30 = arith.constant 0 : index
    %c0_31 = arith.constant 0 : index
    %77 = vector.load %arg2[%c2, %c0_30, %c0_31] : memref<6x16x32xbf16, #tpu.memory_space<vmem>>, vector<1x16x32xbf16>
    %78 = vector.shape_cast %77 : vector<1x16x32xbf16> to vector<16x32xbf16>
    %cst_32 = arith.constant dense<0.000000e+00> : vector<64x32xf32>
    %79 = tpu.matmul %76, %78, %cst_32 {dimension_numbers = #tpu.dot_dimension_numbers<[1], [0], [0], [1], [0, 0, 1, 1], [], []>} : vector<64x16xbf16>, vector<16x32xbf16>, vector<64x32xf32> -> vector<64x32xf32>
    %80 = arith.addf %70, %79 : vector<64x32xf32>
    %81 = vector.broadcast %56 : vector<1x32xf32> to vector<64x32xf32>
    %82 = arith.addf %80, %81 : vector<64x32xf32>
    %83 = vector.extract_strided_slice %82 {offsets = [0, 0], sizes = [64, 16], strides = [1, 1]} : vector<64x32xf32> to vector<64x16xf32>
    %84 = math.tanh %83 : vector<64x16xf32>
    %85 = vector.extract_strided_slice %82 {offsets = [0, 16], sizes = [64, 16], strides = [1, 1]} : vector<64x32xf32> to vector<64x16xf32>
    %86 = arith.negf %85 : vector<64x16xf32>
    %87 = math.exp %86 : vector<64x16xf32>
    %cst_33 = arith.constant 1.000000e+00 : f32
    %88 = vector.broadcast %cst_33 : f32 to vector<64x16xf32>
    %89 = arith.addf %88, %87 : vector<64x16xf32>
    %90 = arith.divf %88, %89 : vector<64x16xf32>
    %91 = arith.mulf %84, %90 : vector<64x16xf32>
    %c0_34 = arith.constant 0 : index
    %c0_35 = arith.constant 0 : index
    %c0_36 = arith.constant 0 : index
    %92 = vector.load %arg5[%c0_34, %c0_35, %c0_36] : memref<2x1x48xf32, #tpu.memory_space<vmem>>, vector<1x1x48xf32>
    %93 = vector.shape_cast %92 : vector<1x1x48xf32> to vector<1x48xf32>
    %c1_i32_37 = arith.constant 1 : i32
    %94 = tpu.dynamic_rotate %91 by %c1_i32_37 dim 0 : vector<64x16xf32>, i32 -> vector<64x16xf32>
    %cst_38 = arith.constant 0.000000e+00 : f32
    %95 = vector.shape_cast %34 : vector<64x1xi1> to vector<64x1xi1>
    %96 = vector.broadcast %95 : vector<64x1xi1> to vector<64x16xi1>
    %97 = vector.broadcast %cst_38 : f32 to vector<64x16xf32>
    %98 = arith.select %96, %94, %97 : vector<64x16xi1>, vector<64x16xf32>
    %99 = arith.truncf %98 : vector<64x16xf32> to vector<64x16xbf16>
    %c0_39 = arith.constant 0 : index
    %c0_40 = arith.constant 0 : index
    %c0_41 = arith.constant 0 : index
    %100 = vector.load %arg4[%c0_39, %c0_40, %c0_41] : memref<6x16x48xbf16, #tpu.memory_space<vmem>>, vector<1x16x48xbf16>
    %101 = vector.shape_cast %100 : vector<1x16x48xbf16> to vector<16x48xbf16>
    %cst_42 = arith.constant dense<0.000000e+00> : vector<64x48xf32>
    %102 = tpu.matmul %99, %101, %cst_42 {dimension_numbers = #tpu.dot_dimension_numbers<[1], [0], [0], [1], [0, 0, 1, 1], [], []>} : vector<64x16xbf16>, vector<16x48xbf16>, vector<64x48xf32> -> vector<64x48xf32>
    %103 = arith.truncf %91 : vector<64x16xf32> to vector<64x16xbf16>
    %c1_43 = arith.constant 1 : index
    %c0_44 = arith.constant 0 : index
    %c0_45 = arith.constant 0 : index
    %104 = vector.load %arg4[%c1_43, %c0_44, %c0_45] : memref<6x16x48xbf16, #tpu.memory_space<vmem>>, vector<1x16x48xbf16>
    %105 = vector.shape_cast %104 : vector<1x16x48xbf16> to vector<16x48xbf16>
    %cst_46 = arith.constant dense<0.000000e+00> : vector<64x48xf32>
    %106 = tpu.matmul %103, %105, %cst_46 {dimension_numbers = #tpu.dot_dimension_numbers<[1], [0], [0], [1], [0, 0, 1, 1], [], []>} : vector<64x16xbf16>, vector<16x48xbf16>, vector<64x48xf32> -> vector<64x48xf32>
    %107 = arith.addf %102, %106 : vector<64x48xf32>
    %c63_i32_47 = arith.constant 63 : i32
    %108 = tpu.dynamic_rotate %91 by %c63_i32_47 dim 0 : vector<64x16xf32>, i32 -> vector<64x16xf32>
    %cst_48 = arith.constant 0.000000e+00 : f32
    %109 = vector.shape_cast %43 : vector<64x1xi1> to vector<64x1xi1>
    %110 = vector.broadcast %109 : vector<64x1xi1> to vector<64x16xi1>
    %111 = vector.broadcast %cst_48 : f32 to vector<64x16xf32>
    %112 = arith.select %110, %108, %111 : vector<64x16xi1>, vector<64x16xf32>
    %113 = arith.truncf %112 : vector<64x16xf32> to vector<64x16xbf16>
    %c2_49 = arith.constant 2 : index
    %c0_50 = arith.constant 0 : index
    %c0_51 = arith.constant 0 : index
    %114 = vector.load %arg4[%c2_49, %c0_50, %c0_51] : memref<6x16x48xbf16, #tpu.memory_space<vmem>>, vector<1x16x48xbf16>
    %115 = vector.shape_cast %114 : vector<1x16x48xbf16> to vector<16x48xbf16>
    %cst_52 = arith.constant dense<0.000000e+00> : vector<64x48xf32>
    %116 = tpu.matmul %113, %115, %cst_52 {dimension_numbers = #tpu.dot_dimension_numbers<[1], [0], [0], [1], [0, 0, 1, 1], [], []>} : vector<64x16xbf16>, vector<16x48xbf16>, vector<64x48xf32> -> vector<64x48xf32>
    %117 = arith.addf %107, %116 : vector<64x48xf32>
    %118 = vector.broadcast %93 : vector<1x48xf32> to vector<64x48xf32>
    %119 = arith.addf %117, %118 : vector<64x48xf32>
    %120 = vector.extract_strided_slice %119 {offsets = [0, 0], sizes = [64, 32], strides = [1, 1]} : vector<64x48xf32> to vector<64x32xf32>
    %121 = arith.addf %54, %120 : vector<64x32xf32>
    %122 = vector.extract_strided_slice %119 {offsets = [0, 32], sizes = [64, 16], strides = [1, 1]} : vector<64x48xf32> to vector<64x16xf32>
    %123 = arith.addf %53, %122 : vector<64x16xf32>
    %cst_53 = arith.constant 0.707106769 : f32
    %124 = vector.broadcast %cst_53 : f32 to vector<64x16xf32>
    %125 = arith.mulf %123, %124 : vector<64x16xf32>
    %c1_54 = arith.constant 1 : index
    %c0_55 = arith.constant 0 : index
    %c0_56 = arith.constant 0 : index
    %126 = vector.load %arg3[%c1_54, %c0_55, %c0_56] : memref<2x1x32xf32, #tpu.memory_space<vmem>>, vector<1x1x32xf32>
    %127 = vector.shape_cast %126 : vector<1x1x32xf32> to vector<1x32xf32>
    %c2_i32_57 = arith.constant 2 : i32
    %128 = tpu.dynamic_rotate %125 by %c2_i32_57 dim 0 : vector<64x16xf32>, i32 -> vector<64x16xf32>
    %cst_58 = arith.constant 0.000000e+00 : f32
    %129 = vector.shape_cast %25 : vector<64x1xi1> to vector<64x1xi1>
    %130 = vector.broadcast %129 : vector<64x1xi1> to vector<64x16xi1>
    %131 = vector.broadcast %cst_58 : f32 to vector<64x16xf32>
    %132 = arith.select %130, %128, %131 : vector<64x16xi1>, vector<64x16xf32>
    %133 = arith.truncf %132 : vector<64x16xf32> to vector<64x16xbf16>
    %c3 = arith.constant 3 : index
    %c0_59 = arith.constant 0 : index
    %c0_60 = arith.constant 0 : index
    %134 = vector.load %arg2[%c3, %c0_59, %c0_60] : memref<6x16x32xbf16, #tpu.memory_space<vmem>>, vector<1x16x32xbf16>
    %135 = vector.shape_cast %134 : vector<1x16x32xbf16> to vector<16x32xbf16>
    %cst_61 = arith.constant dense<0.000000e+00> : vector<64x32xf32>
    %136 = tpu.matmul %133, %135, %cst_61 {dimension_numbers = #tpu.dot_dimension_numbers<[1], [0], [0], [1], [0, 0, 1, 1], [], []>} : vector<64x16xbf16>, vector<16x32xbf16>, vector<64x32xf32> -> vector<64x32xf32>
    %137 = arith.truncf %125 : vector<64x16xf32> to vector<64x16xbf16>
    %c4 = arith.constant 4 : index
    %c0_62 = arith.constant 0 : index
    %c0_63 = arith.constant 0 : index
    %138 = vector.load %arg2[%c4, %c0_62, %c0_63] : memref<6x16x32xbf16, #tpu.memory_space<vmem>>, vector<1x16x32xbf16>
    %139 = vector.shape_cast %138 : vector<1x16x32xbf16> to vector<16x32xbf16>
    %cst_64 = arith.constant dense<0.000000e+00> : vector<64x32xf32>
    %140 = tpu.matmul %137, %139, %cst_64 {dimension_numbers = #tpu.dot_dimension_numbers<[1], [0], [0], [1], [0, 0, 1, 1], [], []>} : vector<64x16xbf16>, vector<16x32xbf16>, vector<64x32xf32> -> vector<64x32xf32>
    %141 = arith.addf %136, %140 : vector<64x32xf32>
    %c62_i32 = arith.constant 62 : i32
    %142 = tpu.dynamic_rotate %125 by %c62_i32 dim 0 : vector<64x16xf32>, i32 -> vector<64x16xf32>
    %cst_65 = arith.constant 0.000000e+00 : f32
    %143 = vector.shape_cast %52 : vector<64x1xi1> to vector<64x1xi1>
    %144 = vector.broadcast %143 : vector<64x1xi1> to vector<64x16xi1>
    %145 = vector.broadcast %cst_65 : f32 to vector<64x16xf32>
    %146 = arith.select %144, %142, %145 : vector<64x16xi1>, vector<64x16xf32>
    %147 = arith.truncf %146 : vector<64x16xf32> to vector<64x16xbf16>
    %c5 = arith.constant 5 : index
    %c0_66 = arith.constant 0 : index
    %c0_67 = arith.constant 0 : index
    %148 = vector.load %arg2[%c5, %c0_66, %c0_67] : memref<6x16x32xbf16, #tpu.memory_space<vmem>>, vector<1x16x32xbf16>
    %149 = vector.shape_cast %148 : vector<1x16x32xbf16> to vector<16x32xbf16>
    %cst_68 = arith.constant dense<0.000000e+00> : vector<64x32xf32>
    %150 = tpu.matmul %147, %149, %cst_68 {dimension_numbers = #tpu.dot_dimension_numbers<[1], [0], [0], [1], [0, 0, 1, 1], [], []>} : vector<64x16xbf16>, vector<16x32xbf16>, vector<64x32xf32> -> vector<64x32xf32>
    %151 = arith.addf %141, %150 : vector<64x32xf32>
    %152 = vector.broadcast %127 : vector<1x32xf32> to vector<64x32xf32>
    %153 = arith.addf %151, %152 : vector<64x32xf32>
    %154 = vector.extract_strided_slice %153 {offsets = [0, 0], sizes = [64, 16], strides = [1, 1]} : vector<64x32xf32> to vector<64x16xf32>
    %155 = math.tanh %154 : vector<64x16xf32>
    %156 = vector.extract_strided_slice %153 {offsets = [0, 16], sizes = [64, 16], strides = [1, 1]} : vector<64x32xf32> to vector<64x16xf32>
    %157 = arith.negf %156 : vector<64x16xf32>
    %158 = math.exp %157 : vector<64x16xf32>
    %cst_69 = arith.constant 1.000000e+00 : f32
    %159 = vector.broadcast %cst_69 : f32 to vector<64x16xf32>
    %160 = arith.addf %159, %158 : vector<64x16xf32>
    %161 = arith.divf %159, %160 : vector<64x16xf32>
    %162 = arith.mulf %155, %161 : vector<64x16xf32>
    %c1_70 = arith.constant 1 : index
    %c0_71 = arith.constant 0 : index
    %c0_72 = arith.constant 0 : index
    %163 = vector.load %arg5[%c1_70, %c0_71, %c0_72] : memref<2x1x48xf32, #tpu.memory_space<vmem>>, vector<1x1x48xf32>
    %164 = vector.shape_cast %163 : vector<1x1x48xf32> to vector<1x48xf32>
    %c1_i32_73 = arith.constant 1 : i32
    %165 = tpu.dynamic_rotate %162 by %c1_i32_73 dim 0 : vector<64x16xf32>, i32 -> vector<64x16xf32>
    %cst_74 = arith.constant 0.000000e+00 : f32
    %166 = vector.shape_cast %34 : vector<64x1xi1> to vector<64x1xi1>
    %167 = vector.broadcast %166 : vector<64x1xi1> to vector<64x16xi1>
    %168 = vector.broadcast %cst_74 : f32 to vector<64x16xf32>
    %169 = arith.select %167, %165, %168 : vector<64x16xi1>, vector<64x16xf32>
    %170 = arith.truncf %169 : vector<64x16xf32> to vector<64x16xbf16>
    %c3_75 = arith.constant 3 : index
    %c0_76 = arith.constant 0 : index
    %c0_77 = arith.constant 0 : index
    %171 = vector.load %arg4[%c3_75, %c0_76, %c0_77] : memref<6x16x48xbf16, #tpu.memory_space<vmem>>, vector<1x16x48xbf16>
    %172 = vector.shape_cast %171 : vector<1x16x48xbf16> to vector<16x48xbf16>
    %cst_78 = arith.constant dense<0.000000e+00> : vector<64x48xf32>
    %173 = tpu.matmul %170, %172, %cst_78 {dimension_numbers = #tpu.dot_dimension_numbers<[1], [0], [0], [1], [0, 0, 1, 1], [], []>} : vector<64x16xbf16>, vector<16x48xbf16>, vector<64x48xf32> -> vector<64x48xf32>
    %174 = arith.truncf %162 : vector<64x16xf32> to vector<64x16xbf16>
    %c4_79 = arith.constant 4 : index
    %c0_80 = arith.constant 0 : index
    %c0_81 = arith.constant 0 : index
    %175 = vector.load %arg4[%c4_79, %c0_80, %c0_81] : memref<6x16x48xbf16, #tpu.memory_space<vmem>>, vector<1x16x48xbf16>
    %176 = vector.shape_cast %175 : vector<1x16x48xbf16> to vector<16x48xbf16>
    %cst_82 = arith.constant dense<0.000000e+00> : vector<64x48xf32>
    %177 = tpu.matmul %174, %176, %cst_82 {dimension_numbers = #tpu.dot_dimension_numbers<[1], [0], [0], [1], [0, 0, 1, 1], [], []>} : vector<64x16xbf16>, vector<16x48xbf16>, vector<64x48xf32> -> vector<64x48xf32>
    %178 = arith.addf %173, %177 : vector<64x48xf32>
    %c63_i32_83 = arith.constant 63 : i32
    %179 = tpu.dynamic_rotate %162 by %c63_i32_83 dim 0 : vector<64x16xf32>, i32 -> vector<64x16xf32>
    %cst_84 = arith.constant 0.000000e+00 : f32
    %180 = vector.shape_cast %43 : vector<64x1xi1> to vector<64x1xi1>
    %181 = vector.broadcast %180 : vector<64x1xi1> to vector<64x16xi1>
    %182 = vector.broadcast %cst_84 : f32 to vector<64x16xf32>
    %183 = arith.select %181, %179, %182 : vector<64x16xi1>, vector<64x16xf32>
    %184 = arith.truncf %183 : vector<64x16xf32> to vector<64x16xbf16>
    %c5_85 = arith.constant 5 : index
    %c0_86 = arith.constant 0 : index
    %c0_87 = arith.constant 0 : index
    %185 = vector.load %arg4[%c5_85, %c0_86, %c0_87] : memref<6x16x48xbf16, #tpu.memory_space<vmem>>, vector<1x16x48xbf16>
    %186 = vector.shape_cast %185 : vector<1x16x48xbf16> to vector<16x48xbf16>
    %cst_88 = arith.constant dense<0.000000e+00> : vector<64x48xf32>
    %187 = tpu.matmul %184, %186, %cst_88 {dimension_numbers = #tpu.dot_dimension_numbers<[1], [0], [0], [1], [0, 0, 1, 1], [], []>} : vector<64x16xbf16>, vector<16x48xbf16>, vector<64x48xf32> -> vector<64x48xf32>
    %188 = arith.addf %178, %187 : vector<64x48xf32>
    %189 = vector.broadcast %164 : vector<1x48xf32> to vector<64x48xf32>
    %190 = arith.addf %188, %189 : vector<64x48xf32>
    %191 = vector.extract_strided_slice %190 {offsets = [0, 0], sizes = [64, 32], strides = [1, 1]} : vector<64x48xf32> to vector<64x32xf32>
    %192 = arith.addf %121, %191 : vector<64x32xf32>
    %cst_89 = arith.constant 0.707106769 : f32
    %193 = vector.broadcast %cst_89 : f32 to vector<64x32xf32>
    %194 = arith.mulf %192, %193 : vector<64x32xf32>
    %c0_90 = arith.constant 0 : index
    %c0_91 = arith.constant 0 : index
    %195 = vector.load %arg6[%c0_90, %c0_91] : memref<64x32xf32, #tpu.memory_space<vmem>>, vector<64x32xf32>
    tpu.vector_store %arg6[%c0_90, %c0_91], %194 {strides = array<i32>} : memref<64x32xf32, #tpu.memory_space<vmem>>, vector<64x32xf32>,
    return
  }
  func.func @transform_0(%arg0: i32) -> (i32, i32) {
    %c0_i32 = arith.constant 0 : i32
    %c0_i32_0 = arith.constant 0 : i32
    %c0_i32_1 = arith.constant 0 : i32
    return %c0_i32, %c0_i32_0 : i32, i32
  }
  func.func @transform_1(%arg0: i32) -> (i32, i32, i32) {
    %c0_i32 = arith.constant 0 : i32
    %c0_i32_0 = arith.constant 0 : i32
    %c0_i32_1 = arith.constant 0 : i32
    %c0_i32_2 = arith.constant 0 : i32
    return %c0_i32, %c0_i32_0, %c0_i32_1 : i32, i32, i32
  }
  func.func @transform_2(%arg0: i32) -> (i32, i32, i32) {
    %c0_i32 = arith.constant 0 : i32
    %c0_i32_0 = arith.constant 0 : i32
    %c0_i32_1 = arith.constant 0 : i32
    %c0_i32_2 = arith.constant 0 : i32
    return %c0_i32, %c0_i32_0, %c0_i32_1 : i32, i32, i32
  }
  func.func @transform_3(%arg0: i32) -> (i32, i32, i32) {
    %c0_i32 = arith.constant 0 : i32
    %c0_i32_0 = arith.constant 0 : i32
    %c0_i32_1 = arith.constant 0 : i32
    %c0_i32_2 = arith.constant 0 : i32
    return %c0_i32, %c0_i32_0, %c0_i32_1 : i32, i32, i32
  }
  func.func @transform_4(%arg0: i32) -> (i32, i32, i32) {
    %c0_i32 = arith.constant 0 : i32
    %c0_i32_0 = arith.constant 0 : i32
    %c0_i32_1 = arith.constant 0 : i32
    %c0_i32_2 = arith.constant 0 : i32
    return %c0_i32, %c0_i32_0, %c0_i32_1 : i32, i32, i32
  }
  func.func @transform_5(%arg0: i32) -> (i32, i32) {
    %c0_i32 = arith.constant 0 : i32
    %c0_i32_0 = arith.constant 0 : i32
    %c0_i32_1 = arith.constant 0 : i32
    return %c0_i32, %c0_i32_0 : i32, i32
  }
}

</mosaic_0001>

<bundles_post_ra>
// kernel: tpu_custom_call.1
= control target key start
LH: loop header
LB: loop body
LE: loop exit
PB: predicated region body
PF: predicated region fallthrough
CT: control target
= control target key end

     0   :  { %10 = vsyncpa [#allocation3], 0  ;;  %s2460_s18 = smov [#allocation2]   ;;  %s3046_s0 = inlined_call_operand.vmem [shape: f32[64,16], index: 0, kind: input, shape index: {}]   ;;  %s3047_s1 = inlined_call_operand.vmem [shape: bf16[6,16,32], index: 1, kind: input, shape index: {}]   ;;  %s3048_s2 = inlined_call_operand.vmem [shape: f32[2,1,32], index: 2, kind: input, shape index: {}]   ;;  %s3049_s3 = inlined_call_operand.hbm [shape: bf16[6,16,48], index: 3, kind: input, shape index: {}]   ;;  %s3050_s4 = inlined_call_operand.vmem [shape: f32[2,1,48], index: 4, kind: input, shape index: {}]   ;;  %s3051_s5 = inlined_call_operand.vmem [shape: f32[64,32], index: 5, kind: output, shape index: {}]  }
   0x1   :  { %s22_s19 = sshll.u32 %s2460_s18, 4  ;;  %s2436_s22 = scalar_lea.hbm %s3049_s3, 768  ;;  %s23_s19 = int_to_ptr.vmem [resolvable:$true] %s22_s19 }
   0x2   :  { %p2437_p0 = scmp.ne.s32.totalorder %s3049_s3, %s2436_s22  ;;  %p2440_p1 = scmp.lt.u32.totalorder %s2436_s22, %s3049_s3 }
   0x4   :  { %p2442_p2 = pnand %p2440_p1, %p2437_p0 }
   0x6   :  { %2445 = shalt.err (!%p2442_p2)
}
   0x7   :  { %s2446_s27 = scalar_lea.vmem %s23_s19, 768  ;;  %p2451_p4 = scmp.lt.s32.totalorder %s23_s19, %s23_s19 }
   0x8   :  { %p2447_p3 = scmp.ne.s32.totalorder %s23_s19, %s2446_s27  ;;  %p2452_p5 = scmp.lt.s32.totalorder %s2446_s27, %s2446_s27 }
   0xa   :  { %p2453_p6 = por %p2452_p5, %p2451_p4 }
   0xc   :  { %p2454_p7 = pnand %p2453_p6, %p2447_p3 }
   0xe   :  { %2457 = shalt.err (!%p2454_p7)
}
   0xf   :  { %s2461_s28 = smov 64   ;;  %s2462_s29 = smov 4  }
  0x10   :  { %28 = dma.hbm_to_vmem [thread:$0]  %s3049_s3, 768, %s23_s19, [#allocation3], %s2461_s28, %s2461_s28, %s2462_s29  }
  0x11   :  { %2458 = dma.done.wait [#allocation3], 768  }
  0x12   :  { %2459 = vsyncadd [#allocation3], 4294966528  ;;  %v35_v0 = vlaneseq  ;;  %v2328_v3 = vld [vmem:[%s3047_s1 + $0x8] sm:$0xff]   ;;  %v2519_v5 = vld [vmem:[%s3046_s0] sm:$0xff]  ;;  %vm337_vm0 = vcmask 130048   ;;  %s2463_s29 = smov 112  }
  0x13   :  { %v2524_v6 = vld [vmem:[%s3046_s0 + $0x8] sm:$0xff]  ;;  %v2529_v7 = vld [vmem:[%s3046_s0 + $0x10] sm:$0xff]  ;;  %2139 = vmatprep.subr.bf16.mxu0 %v2328_v3  ;;  %v2536_v9 = vld [vmem:[%s3046_s0 + $0x18] sm:$0xff]  ;;  %v277_v13 = vrot.slane %v2519_v5, 7  ;;  %v498_v42 = vrot.slane %v2519_v5, 1  ;;  %s2464_s9 = smov 96  }
  0x14   :  { %v2507_v1 = vshrl.u32 %v35_v0, 7  ;;  %v324_v8 = vpack.c.bf16 %v2524_v6, %v2519_v5  ;;  %2140 = vmatpush3.bf16.msra.mxu0 %v2328_v3  ;;  %v325_v11 = vpack.c.bf16 %v2536_v9, %v2529_v7  ;;  %v2329_v12 = vld [vmem:[%s3047_s1] sm:$0xff]   ;;  %v278_v14 = vrot.slane %v2524_v6, 7  ;;  %v2558_v16 = vld [vmem:[%s3046_s0 + $0x28] sm:$0xff]  ;;  %v2566_v19 = vld [vmem:[%s3046_s0 + $0x38] sm:$0xff] }
  0x15   :  { %v2553_v15 = vld [vmem:[%s3046_s0 + $0x20] sm:$0xff]  ;;  %2149 = vmatprep.subr.bf16.mxu0 %v2329_v12  ;;  %v284_v20 = vrot.slane %v2566_v19, 7  ;;  %v2330_v21 = vld [vmem:[%s3047_s1 + $0x10] sm:$0xff]   ;;  %v279_v29 = vrot.slane %v2529_v7, 7  ;;  %v280_v30 = vrot.slane %v2536_v9, 7  ;;  %v282_v32 = vrot.slane %v2558_v16, 7 }
  0x16   :  { %v48_v2 = vand.u32 31, %v2507_v1  ;;  %v2514_v4 = vadd.s32 32, %v2507_v1  ;;  %2141 = vmatprep.mubr.msk.bf16.mxu0 %vm337_vm0, %v324_v8  ;;  %v326_v18 = vpack.c.bf16 %v2558_v16, %v2553_v15  ;;  %vm285_vm1 = vcmp.lt.s32.totalorder %v2507_v1, 1  ;;  %v2579_v22 = vld [vmem:[%s3046_s0 + $0x30] sm:$0xff] }
  0x17   :  { %2142 = vmatmul.mubr.msk.bf16.vlgmr.msra.gmra.mrb[0].mxu0 %vm337_vm0, %v325_v11  ;;  %v292_v23 = vsel %vm285_vm1, %v277_v13, %v278_v14  ;;  %v293_v24 = vsel %vm285_vm1, %v284_v20, %v277_v13  ;;  %v281_v27 = vrot.slane %v2553_v15, 7  ;;  %v327_v28 = vpack.c.bf16 %v2566_v19, %v2579_v22 }
  0x18   :  { %v2540_v10 = vadd.s32 4294967295, %v48_v2  ;;  %v76_v17 = vand.u32 31, %v2514_v4  ;;  %2150 = vmatpush3.bf16.msra.mxu0 %v2329_v12  ;;  %2145 = vmatprep.mubr.msk.bf16.mxu0 %vm337_vm0, %v326_v18  ;;  %v290_v34 = vsel %vm285_vm1, %v279_v29, %v280_v30  ;;  %v291_v35 = vsel %vm285_vm1, %v278_v14, %v279_v29 }
  0x19   :  { %2159 = vmatprep.subr.bf16.mxu0 %v2330_v21  ;;  %v289_v33 = vsel %vm285_vm1, %v280_v30, %v281_v27  ;;  %v288_v36 = vsel %vm285_vm1, %v281_v27, %v282_v32  ;;  %v2611_v38 = vadd.s32 24, %v2507_v1  ;;  %v319_v39 = vpack.c.bf16 %v290_v34, %v291_v35 }
  0x1a   :  { %vm180_vm2 = vcmp.ge.s32.totalorder %v2540_v10, 0  ;;  %v2587_v25 = vadd.s32 4294967295, %v76_v17  ;;  %v283_v41 = vrot.slane %v2579_v22, 7  ;;  %v499_v43 = vrot.slane %v2524_v6, 1 }
  0x1b   :  { %v310_v26 = vsel %vm180_vm2, %v293_v24, 0.0  ;;  %v500_v44 = vrot.slane %v2529_v7, 1  ;;  %v69_v45 = vand.u32 31, %v2611_v38  ;;  %vm506_vm4 = vcmp.lt.s32.totalorder %v2507_v1, 7 }
  0x1c   :  { %v318_v31 = vpack.c.bf16 %v292_v23, %v310_v26  ;;  %vm184_vm3 = vcmp.ge.s32.totalorder %v2587_v25, 0  ;;  %v501_v46 = vrot.slane %v2536_v9, 1  ;;  %v286_v47 = vsel %vm285_vm1, %v283_v41, %v284_v20  ;;  %v2006_v20 = vld [vmem:[%s3048_s2] ss:$0 sm:$0xff] }
  0x1d   :  { %v314_v37 = vsel %vm184_vm3, %v289_v33, 0.0  ;;  %v287_v48 = vsel %vm285_vm1, %v282_v32, %v283_v41  ;;  %v2627_v49 = vadd.s32 56, %v2507_v1  ;;  %v502_v50 = vrot.slane %v2553_v15, 1 }
  0x1e   :  { %v320_v40 = vpack.c.bf16 %v288_v36, %v314_v37  ;;  %v512_v51 = vsel %vm506_vm4, %v499_v43, %v500_v44  ;;  %v513_v52 = vsel %vm506_vm4, %v498_v42, %v499_v43  ;;  %v2636_v53 = vadd.s32 1, %v69_v45 }
  0x1f   :  { %2146 = vmatmul.mubr.msk.bf16.gmra.mrb[4].mxu0 %vm337_vm0, %v327_v28  ;;  %v321_v54 = vpack.c.bf16 %v286_v47, %v287_v48  ;;  %v539_v55 = vpack.c.bf16 %v512_v51, %v513_v52  ;;  %v97_v56 = vand.u32 31, %v2627_v49  ;;  %v510_v57 = vsel %vm506_vm4, %v501_v46, %v502_v50 }
  0x20   :  { %2151 = vmatprep.mubr.msk.bf16.mxu0 %vm337_vm0, %v318_v31  ;;  %vm223_vm5 = vcmp.lt.s32.totalorder %v2636_v53, 32  ;;  %v503_v58 = vrot.slane %v2558_v16, 1  ;;  %v504_v59 = vrot.slane %v2579_v22, 1  ;;  %v511_v60 = vsel %vm506_vm4, %v500_v44, %v501_v46 }
  0x21   :  { %v534_v61 = vsel %vm223_vm5, %v510_v57, 0.0  ;;  %v2656_v0 = vadd.s32 1, %v97_v56  ;;  %v505_v3 = vrot.slane %v2566_v19, 1  ;;  %vm1153_vm7 = vcmp.lt.s32.totalorder %v2507_v1, 2 }
  0x22   :  { %v508_v62 = vsel %vm506_vm4, %v503_v58, %v504_v59  ;;  %v509_v63 = vsel %vm506_vm4, %v502_v50, %v503_v58  ;;  %v540_v8 = vpack.c.bf16 %v534_v61, %v511_v60  ;;  %vm1374_vm10 = vcmp.lt.s32.totalorder %v2507_v1, 6  ;;  %v2078_v1 = vld [vmem:[%s3050_s4 + $0x1] ss:$0 sm:$0xff] }
  0x23   :  { %v541_v11 = vpack.c.bf16 %v508_v62, %v509_v63  ;;  %vm227_vm6 = vcmp.lt.s32.totalorder %v2656_v0, 32  ;;  %v514_v12 = vsel %vm506_vm4, %v505_v3, %v498_v42  ;;  %v507_v13 = vsel %vm506_vm4, %v504_v59, %v505_v3  ;;  %v2331_v62 = vld [vmem:[#allocation2 + $0x8] sm:$0xff]  }
  0x24   :  { %v538_v14 = vsel %vm227_vm6, %v514_v12, 0.0  ;;  %2169 = vmatprep.subr.bf16.mxu1 %v2331_v62  ;;  %vm1973_vm13 = vcmask 261120  }
  0x25   :  { %v542_v18 = vpack.c.bf16 %v538_v14, %v507_v13  ;;  %2170 = vmatpush3.bf16.msra.mxu1 %v2331_v62 }
  0x27   :  { %2152 = vmatmul.mubr.msk.bf16.vlgmr.msra.gmra.mrb[0].mxu0 %vm337_vm0, %v319_v39 }
  0x28   :  { %2160 = vmatpush3.bf16.msra.mxu0 %v2330_v21  ;;  %2155 = vmatprep.mubr.msk.bf16.mxu0 %vm337_vm0, %v320_v40 }
  0x2f   :  { %2156 = vmatmul.mubr.msk.bf16.gmra.mrb[4].mxu0 %vm337_vm0, %v321_v54 }
  0x30   :  { %2161 = vmatprep.mubr.msk.bf16.mxu0 %vm337_vm0, %v539_v55 }
  0x37   :  { %2162 = vmatmul.mubr.msk.bf16.vlgmr.msra.gmra.mrb[0].mxu0 %vm337_vm0, %v540_v8 }
  0x38   :  { %2165 = vmatprep.mubr.msk.bf16.mxu0 %vm337_vm0, %v541_v11 }
  0x3f   :  { %2166 = vmatmul.mubr.msk.bf16.gmra.mrb[4].mxu0 %vm337_vm0, %v542_v18 }
 0x10a   :  { %v2163_v21 = vpop.f32.mrb[0].mxu0 }
 0x10b   :  { %v2672_v23 = vadd.f32 %v2163_v21, %v2006_v20  ;;  %v598_v24 = vpop.f32.mrb[1].mxu0 }
 0x10c   :  { %v2674_v26 = vadd.f32 %v2006_v20, %v598_v24  ;;  %v2164_v27 = vpop.f32.mrb[2].mxu0  ;;  %v2332_v24 = vld [vmem:[#allocation2] sm:$0xff]  }
 0x10d   :  { %v2009_v28 = vmul.f32 -1.442695, %v2672_v23  ;;  %v2677_v29 = vadd.f32 %v2164_v27, %v2006_v20  ;;  %v601_v30 = vpop.f32.mrb[3].mxu0  ;;  %2179 = vmatprep.subr.bf16.mxu1 %v2332_v24 }
 0x10e   :  { %v2007_v31 = vmul.f32 -1.442695, %v2674_v26  ;;  %v2680_v32 = vadd.f32 %v2006_v20, %v601_v30 }
 0x10f   :  { %2340 = vpow2.f32 %v2009_v28  ;;  %v2010_v33 = vmul.f32 -1.442695, %v2677_v29 }
 0x110   :  { %2342 = vpow2.f32 %v2007_v31  ;;  %v2008_v34 = vmul.f32 -1.442695, %v2680_v32 }
 0x111   :  { %2344 = vpow2.f32 %v2010_v33 }
 0x112   :  { %v2167_v35 = vpop.f32.mrb[4].mxu0  ;;  %2346 = vpow2.f32 %v2008_v34 }
 0x113   :  { %v2684_v36 = vadd.f32 %v2167_v35, %v2006_v20  ;;  %v614_v37 = vpop.f32.mrb[5].mxu0 }
 0x114   :  { %v647_v39 = vadd.f32 %v2006_v20, %v614_v37  ;;  %v2168_v40 = vpop.f32.mrb[6].mxu0 }
 0x115   :  { %v2013_v41 = vmul.f32 -1.442695, %v2684_v36  ;;  %v2687_v42 = vadd.f32 %v2168_v40, %v2006_v20  ;;  %v617_v43 = vpop.f32.mrb[7].mxu0 }
 0x116   :  { %v2011_v44 = vmul.f32 -1.442695, %v647_v39  ;;  %v2689_v46 = vadd.f32 %v2006_v20, %v617_v43 }
 0x117   :  { %2348 = vpow2.f32 %v2013_v41  ;;  %v2014_v47 = vmul.f32 -1.442695, %v2687_v42 }
 0x118   :  { %2350 = vpow2.f32 %v2011_v44  ;;  %v2012_v52 = vmul.f32 -1.442695, %v2689_v46 }
 0x119   :  { %v2341_v48 = vpop.eup %2340  ;;  %2352 = vpow2.f32 %v2014_v47 }
 0x11a   :  { %v2343_v50 = vpop.eup %2342  ;;  %v685_v51 = vadd.f32 1.0, %v2341_v48 }
 0x11b   :  { %v683_v54 = vadd.f32 1.0, %v2343_v50  ;;  %v2345_v55 = vpop.eup %2344 }
 0x11c   :  { %2354 = vrcp.f32 %v685_v51  ;;  %v686_v57 = vadd.f32 1.0, %v2345_v55  ;;  %v2347_v58 = vpop.eup %2346 }
 0x11d   :  { %2356 = vrcp.f32 %v683_v54  ;;  %v684_v59 = vadd.f32 1.0, %v2347_v58 }
 0x11e   :  { %2358 = vpow2.f32 %v2012_v52 }
 0x11f   :  { %2360 = vrcp.f32 %v686_v57 }
 0x120   :  { %2362 = vrcp.f32 %v684_v59 }
 0x121   :  { %v2349_v60 = vpop.eup %2348 }
 0x122   :  { %v2351_v61 = vpop.eup %2350  ;;  %v689_v8 = vadd.f32 1.0, %v2349_v60 }
 0x123   :  { %v687_v63 = vadd.f32 1.0, %v2351_v61  ;;  %v2353_v3 = vpop.eup %2352  ;;  %v2333_v61 = vld [vmem:[#allocation2 + $0x10] sm:$0xff]  }
 0x124   :  { %v690_v21 = vadd.f32 1.0, %v2353_v3 }
 0x125   :  { %2364 = vrcp.f32 %v687_v63 }
 0x126   :  { %v2355_v11 = vpop.eup %2354  ;;  %2366 = vrcp.f32 %v689_v8 }
 0x127   :  { %v2357_v12 = vpop.eup %2356  ;;  %719 = vrot.lane.b32.xlu1 %v2355_v11, %s2463_s29 }
 0x128   :  { %v2359_v13 = vpop.eup %2358  ;;  %715 = vrot.lane.b32.xlu0 %v2357_v12, %s2463_s29 }
 0x129   :  { %v688_v14 = vadd.f32 1.0, %v2359_v13  ;;  %v2361_v18 = vpop.eup %2360 }
 0x12a   :  { %v2363_v20 = vpop.eup %2362 }
 0x12b   :  { %2368 = vrcp.f32 %v688_v14  ;;  %721 = vrot.lane.b32.xlu1 %v2361_v18, %s2463_s29 }
 0x12c   :  { %717 = vrot.lane.b32.xlu0 %v2363_v20, %s2463_s29  ;;  %2370 = vrcp.f32 %v690_v21 }
 0x12d   :  { %2372 = vtanh.f32 %v2672_v23 }
 0x12e   :  { %2374 = vtanh.f32 %v2674_v26 }
 0x12f   :  { %v2365_v27 = vpop.eup %2364  ;;  %2376 = vtanh.f32 %v2677_v29 }
 0x130   :  { %723 = vrot.lane.b32.xlu0 %v2365_v27, %s2463_s29  ;;  %v2367_v28 = vpop.eup %2366  ;;  %2378 = vtanh.f32 %v2680_v32 }
 0x131   :  { %2380 = vtanh.f32 %v647_v39 }
 0x132   :  { %2382 = vtanh.f32 %v2684_v36 }
 0x133   :  { %2384 = vtanh.f32 %v2689_v46 }
 0x134   :  { %727 = vrot.lane.b32.xlu0 %v2367_v28, %s2463_s29  ;;  %2386 = vtanh.f32 %v2687_v42 }
 0x135   :  { %v2369_v30 = vpop.eup %2368 }
 0x136   :  { %725 = vrot.lane.b32.xlu1 %v2369_v30, %s2463_s29  ;;  %v2371_v31 = vpop.eup %2370 }
 0x137   :  { %v2373_v34 = vpop.eup %2372 }
 0x138   :  { %v2375_v40 = vpop.eup %2374 }
 0x139   :  { %v2377_v41 = vpop.eup %2376 }
 0x13a   :  { %729 = vrot.lane.b32.xlu1 %v2371_v31, %s2463_s29  ;;  %v2379_v47 = vpop.eup %2378 }
 0x13b   :  { %v2381_v57 = vpop.eup %2380 }
 0x13c   :  { %v2383_v18 = vpop.eup %2382 }
 0x13d   :  { %v2385_v30 = vpop.eup %2384 }
 0x199   :  { %v720_v33 = vpop.permute.xlu1 %719 }
 0x19a   :  { %v716_v35 = vpop.permute.xlu0 %715  ;;  %v741_v37 = vmul.f32 %v2373_v34, %v720_v33 }
 0x19b   :  { %v2706_v43 = vmul.f32 %v2375_v40, %v716_v35 }
 0x19c   :  { %v750_v29 = vrot.slane %v741_v37, 7  ;;  %v953_v32 = vrot.slane %v741_v37, 1 }
 0x19d   :  { %v722_v44 = vpop.permute.xlu1 %721  ;;  %v748_v52 = vrot.slane %v2706_v43, 7  ;;  %v951_v58 = vrot.slane %v2706_v43, 1 }
 0x19e   :  { %v742_v23 = vmul.f32 %v2377_v41, %v722_v44  ;;  %v718_v26 = vpop.permute.xlu0 %717 }
 0x19f   :  { %v740_v48 = vmul.f32 %v2379_v47, %v718_v26  ;;  %v2387_v47 = vpop.eup %2386 }
 0x1a0   :  { %v751_v39 = vrot.slane %v742_v23, 7  ;;  %v779_v50 = vpack.c.bf16 %v742_v23, %v741_v37  ;;  %v954_v51 = vrot.slane %v742_v23, 1 }
 0x1a1   :  { %v749_v54 = vrot.slane %v740_v48, 7  ;;  %v952_v55 = vrot.slane %v740_v48, 1  ;;  %v778_v36 = vpack.c.bf16 %v740_v48, %v2706_v43 }
 0x1a2   :  { %v760_v46 = vsel %vm285_vm1, %v750_v29, %v751_v39  ;;  %v963_v59 = vsel %vm506_vm4, %v953_v32, %v954_v51  ;;  %v724_v60 = vpop.permute.xlu0 %723 }
 0x1a3   :  { %v761_v62 = vsel %vm285_vm1, %v749_v54, %v750_v29  ;;  %v743_v63 = vmul.f32 %v2381_v57, %v724_v60  ;;  %2171 = vmatprep.mubr.msk.bf16.mxu1 %vm337_vm0, %v778_v36  ;;  %v762_v3 = vsel %vm285_vm1, %v748_v52, %v749_v54  ;;  %v964_v42 = vsel %vm506_vm4, %v952_v55, %v953_v32 }
 0x1a4   :  { %v773_v8 = vpack.c.bf16 %v760_v46, %v761_v62  ;;  %2172 = vmatmul.mubr.msk.bf16.vlgmr.msra.gmra.mrb[0].mxu1 %vm337_vm0, %v779_v50  ;;  %v965_v11 = vsel %vm506_vm4, %v951_v58, %v952_v55 }
 0x1a5   :  { %v752_v12 = vrot.slane %v743_v63, 7  ;;  %v955_v13 = vrot.slane %v743_v63, 1  ;;  %2180 = vmatpush3.bf16.msra.mxu1 %v2332_v24  ;;  %v975_v14 = vpack.c.bf16 %v964_v42, %v965_v11 }
 0x1a6   :  { %v728_v20 = vpop.permute.xlu0 %727  ;;  %2189 = vmatprep.subr.bf16.mxu1 %v2333_v61 }
 0x1a7   :  { %v962_v21 = vsel %vm506_vm4, %v954_v51, %v955_v13  ;;  %v745_v27 = vmul.f32 %v2383_v18, %v728_v20  ;;  %v759_v28 = vsel %vm285_vm1, %v751_v39, %v752_v12 }
 0x1a8   :  { %v970_v31 = vsel %vm223_vm5, %v962_v21, 0.0  ;;  %v726_v33 = vpop.permute.xlu1 %725  ;;  %v768_v44 = vsel %vm184_vm3, %v759_v28, 0.0  ;;  %v2335_v28 = vld [vmem:[%s3047_s1 + $0x18] sm:$0xff]  }
 0x1a9   :  { %v976_v34 = vpack.c.bf16 %v970_v31, %v963_v59  ;;  %v744_v35 = vmul.f32 %v2385_v30, %v726_v33  ;;  %v754_v37 = vrot.slane %v745_v27, 7  ;;  %v957_v24 = vrot.slane %v745_v27, 1 }
 0x1ab   :  { %v753_v40 = vrot.slane %v744_v35, 7  ;;  %v780_v41 = vpack.c.bf16 %v744_v35, %v743_v63  ;;  %v956_v43 = vrot.slane %v744_v35, 1 }
 0x1ac   :  { %v730_v23 = vpop.permute.xlu1 %729 }
 0x1ad   :  { %v746_v26 = vmul.f32 %v2387_v47, %v730_v23  ;;  %2175 = vmatprep.mubr.msk.bf16.mxu1 %vm337_vm0, %v780_v41  ;;  %v758_v29 = vsel %vm285_vm1, %v752_v12, %v753_v40  ;;  %v757_v48 = vsel %vm285_vm1, %v753_v40, %v754_v37  ;;  %v960_v32 = vsel %vm506_vm4, %v956_v43, %v957_v24 }
 0x1ae   :  { %v774_v39 = vpack.c.bf16 %v758_v29, %v768_v44  ;;  %v961_v50 = vsel %vm506_vm4, %v955_v13, %v956_v43 }
 0x1af   :  { %v755_v51 = vrot.slane %v746_v26, 7  ;;  %v781_v54 = vpack.c.bf16 %v746_v26, %v745_v27  ;;  %v958_v55 = vrot.slane %v746_v26, 1  ;;  %v977_v36 = vpack.c.bf16 %v960_v32, %v961_v50 }
 0x1b1   :  { %2176 = vmatmul.mubr.msk.bf16.gmra.mrb[4].mxu1 %vm337_vm0, %v781_v54  ;;  %v763_v57 = vsel %vm285_vm1, %v755_v51, %v748_v52  ;;  %v756_v46 = vsel %vm285_vm1, %v754_v37, %v755_v51  ;;  %v959_v59 = vsel %vm506_vm4, %v957_v24, %v958_v55  ;;  %v966_v60 = vsel %vm506_vm4, %v958_v55, %v951_v58  ;;  %v2334_v52 = vld [vmem:[%s3047_s1 + $0x20] sm:$0xff]  }
 0x1b2   :  { %v764_v62 = vsel %vm180_vm2, %v763_v57, 0.0  ;;  %v775_v63 = vpack.c.bf16 %v756_v46, %v757_v48  ;;  %v974_v42 = vsel %vm227_vm6, %v966_v60, 0.0  ;;  %2199 = vmatprep.subr.bf16.mxu0 %v2334_v52  ;;  %v2030_v58 = vld [vmem:[%s3050_s4] ss:$0 sm:$0xff] }
 0x1b3   :  { %v772_v11 = vpack.c.bf16 %v762_v3, %v764_v62  ;;  %v978_v12 = vpack.c.bf16 %v974_v42, %v959_v59  ;;  %2200 = vmatpush3.bf16.msra.mxu0 %v2334_v52  ;;  %v140_v62 = vadd.s32 4294967294, %v48_v2 }
 0x1b4   :  { %2209 = vmatprep.subr.bf16.mxu0 %v2335_v28 }
 0x1b5   :  { %2181 = vmatprep.mubr.msk.bf16.mxu1 %vm337_vm0, %v772_v11  ;;  %vm148_vm8 = vcmp.ge.s32.totalorder %v140_v62, 0  ;;  %v2337_v62 = vld [vmem:[#allocation2 + $0x20] sm:$0xff]  }
 0x1b9   :  { %2182 = vmatmul.mubr.msk.bf16.vlgmr.msra.gmra.mrb[0].mxu1 %vm337_vm0, %v773_v8 }
 0x1ba   :  { %2185 = vmatprep.mubr.msk.bf16.mxu1 %vm337_vm0, %v774_v39  ;;  %2190 = vmatpush3.bf16.msra.mxu1 %v2333_v61 }
 0x1bb   :  { %2229 = vmatprep.subr.bf16.mxu1 %v2337_v62 }
 0x1c1   :  { %2186 = vmatmul.mubr.msk.bf16.gmra.mrb[4].mxu1 %vm337_vm0, %v775_v63 }
 0x1c2   :  { %2191 = vmatprep.mubr.msk.bf16.mxu1 %vm337_vm0, %v975_v14 }
 0x1c9   :  { %2192 = vmatmul.mubr.msk.bf16.vlgmr.msra.gmra.mrb[0].mxu1 %vm337_vm0, %v976_v34 }
 0x1ca   :  { %2195 = vmatprep.mubr.msk.bf16.mxu1 %vm337_vm0, %v977_v36  ;;  %2230 = vmatpush3.bf16.msra.mxu1 %v2337_v62 }
 0x1d1   :  { %2196 = vmatmul.mubr.msk.bf16.gmra.mrb[4].mxu1 %vm337_vm0, %v978_v12 }
 0x29c   :  { %v2193_v61 = vpop.f32.mrb[0].mxu1 }
 0x29d   :  { %v1034_v3 = vpop.f32.mrb[1].mxu1  ;;  %v2776_v20 = vadd.f32 %v2193_v61, %v2030_v58 }
 0x29e   :  { %v2771_v8 = vadd.f32 %v2030_v58, %v1034_v3  ;;  %v2194_v13 = vpop.f32.mrb[2].mxu1 }
 0x29f   :  { %v1037_v14 = vpop.f32.mrb[3].mxu1  ;;  %v2779_v21 = vadd.f32 %v2194_v13, %v2030_v58 }
 0x2a0   :  { %v2773_v18 = vadd.f32 %v2030_v58, %v1037_v14  ;;  %1103 = vrot.lane.b32.xlu0 %v2771_v8, %s2464_s9 }
 0x2a2   :  { %1105 = vrot.lane.b32.xlu1 %v2773_v18, %s2464_s9 }
 0x2a4   :  { %1107 = vrot.lane.b32.xlu0 %v2776_v20, %s2464_s9  ;;  %v2197_v27 = vpop.f32.mrb[4].mxu1 }
 0x2a5   :  { %v1050_v30 = vpop.f32.mrb[5].mxu1  ;;  %v2791_v37 = vadd.f32 %v2197_v27, %v2030_v58 }
 0x2a6   :  { %v2785_v31 = vadd.f32 %v2030_v58, %v1050_v30  ;;  %1109 = vrot.lane.b32.xlu1 %v2779_v21, %s2464_s9  ;;  %v2198_v33 = vpop.f32.mrb[6].mxu1 }
 0x2a7   :  { %v1053_v34 = vpop.f32.mrb[7].mxu1  ;;  %v2794_v24 = vadd.f32 %v2198_v33, %v2030_v58 }
 0x2a8   :  { %v2788_v35 = vadd.f32 %v2030_v58, %v1053_v34  ;;  %1111 = vrot.lane.b32.xlu0 %v2785_v31, %s2464_s9 }
 0x2aa   :  { %1113 = vrot.lane.b32.xlu1 %v2788_v35, %s2464_s9 }
 0x2ac   :  { %1115 = vrot.lane.b32.xlu0 %v2791_v37, %s2464_s9 }
 0x2ae   :  { %1117 = vrot.lane.b32.xlu1 %v2794_v24, %s2464_s9 }
 0x312   :  { %v1104_v40 = vpop.permute.xlu0 %1103 }
 0x313   :  { %v1127_v41 = vadd.f32 %v1104_v40, %v2519_v5 }
 0x314   :  { %v1106_v43 = vpop.permute.xlu1 %1105 }
 0x315   :  { %v1128_v44 = vadd.f32 %v1106_v43, %v2524_v6  ;;  %v2800_v23 = vmul.f32 0.70710677, %v1127_v41 }
 0x316   :  { %v1108_v47 = vpop.permute.xlu0 %1107 }
 0x317   :  { %v2802_v26 = vmul.f32 0.70710677, %v1128_v44  ;;  %v1129_v29 = vadd.f32 %v1108_v47, %v2529_v7 }
 0x318   :  { %v1110_v48 = vpop.permute.xlu1 %1109 }
 0x319   :  { %v1193_v32 = vpack.c.bf16 %v2802_v26, %v2800_v23  ;;  %v1130_v39 = vadd.f32 %v1110_v48, %v2536_v9  ;;  %v2810_v5 = vmul.f32 0.70710677, %v1129_v29  ;;  %v2336_v9 = vld [vmem:[%s3047_s1 + $0x28] sm:$0xff]   ;;  %v1146_v11 = vrot.slane %v2802_v26, 6 }
 0x31a   :  { %v1112_v50 = vpop.permute.xlu0 %1111  ;;  %v1367_v47 = vrot.slane %v2802_v26, 2  ;;  %v1366_v48 = vrot.slane %v2800_v23, 2 }
 0x31b   :  { %v1131_v51 = vadd.f32 %v1112_v50, %v2553_v15  ;;  %2201 = vmatprep.mubr.msk.bf16.mxu0 %vm337_vm0, %v1193_v32  ;;  %v2812_v6 = vmul.f32 0.70710677, %v1130_v39  ;;  %v1368_v43 = vrot.slane %v2810_v5, 2  ;;  %v239_v32 = vadd.s32 2, %v69_v45 }
 0x31c   :  { %v1114_v54 = vpop.permute.xlu1 %1113 }
 0x31d   :  { %v1132_v55 = vadd.f32 %v1114_v54, %v2558_v16  ;;  %v1194_v7 = vpack.c.bf16 %v2812_v6, %v2810_v5  ;;  %v2820_v57 = vmul.f32 0.70710677, %v1131_v51  ;;  %v1148_v58 = vrot.slane %v2812_v6, 6 }
 0x31e   :  { %v1116_v36 = vpop.permute.xlu0 %1115  ;;  %v1380_v50 = vsel %vm1374_vm10, %v1367_v47, %v1368_v43  ;;  %v1369_v26 = vrot.slane %v2812_v6, 2  ;;  %v1381_v54 = vsel %vm1374_vm10, %v1366_v48, %v1367_v47  ;;  %vm255_vm11 = vcmp.lt.s32.totalorder %v239_v32, 32 }
 0x31f   :  { %v2822_v15 = vmul.f32 0.70710677, %v1132_v55  ;;  %v1133_v46 = vadd.f32 %v1116_v36, %v2579_v22  ;;  %2202 = vmatmul.mubr.msk.bf16.vlgmr.msra.gmra.mrb[8].mxu0 %vm337_vm0, %v1194_v7  ;;  %v144_v22 = vadd.s32 4294967294, %v76_v17  ;;  %v1149_v12 = vrot.slane %v2820_v57, 6 }
 0x320   :  { %v1118_v59 = vpop.permute.xlu1 %1117  ;;  %2210 = vmatpush3.bf16.msra.mxu0 %v2335_v28  ;;  %v1147_v17 = vrot.slane %v2810_v5, 6  ;;  %v1370_v39 = vrot.slane %v2820_v57, 2  ;;  %v1407_v55 = vpack.c.bf16 %v1380_v50, %v1381_v54 }
 0x321   :  { %v1195_v16 = vpack.c.bf16 %v2822_v15, %v2820_v57  ;;  %v1134_v60 = vadd.f32 %v1118_v59, %v2566_v19  ;;  %2219 = vmatprep.subr.bf16.mxu0 %v2336_v9  ;;  %v2832_v63 = vmul.f32 0.70710677, %v1133_v46  ;;  %v1145_v19 = vrot.slane %v2800_v23, 6 }
 0x322   :  { %v1150_v61 = vrot.slane %v2822_v15, 6  ;;  %vm152_vm9 = vcmp.ge.s32.totalorder %v144_v22, 0  ;;  %v1157_v14 = vsel %vm1153_vm7, %v1148_v58, %v1149_v12  ;;  %v1158_v28 = vsel %vm1153_vm7, %v1147_v17, %v1148_v58 }
 0x323   :  { %2205 = vmatprep.mubr.msk.bf16.mxu0 %vm337_vm0, %v1195_v16  ;;  %v2834_v42 = vmul.f32 0.70710677, %v1134_v60  ;;  %v1160_v3 = vsel %vm1153_vm7, %v1145_v19, %v1146_v11  ;;  %v1182_v33 = vsel %vm152_vm9, %v1157_v14, 0.0  ;;  %v1159_v34 = vsel %vm1153_vm7, %v1146_v11, %v1147_v17 }
 0x324   :  { %v1156_v30 = vsel %vm1153_vm7, %v1149_v12, %v1150_v61  ;;  %v1187_v40 = vpack.c.bf16 %v1158_v28, %v1159_v34  ;;  %v1151_v44 = vrot.slane %v2832_v63, 6  ;;  %v1378_v38 = vsel %vm1374_vm10, %v1369_v26, %v1370_v39 }
 0x325   :  { %v1152_v2 = vrot.slane %v2834_v42, 6  ;;  %v1196_v52 = vpack.c.bf16 %v2834_v42, %v2832_v63  ;;  %v1188_v41 = vpack.c.bf16 %v1156_v30, %v1182_v33  ;;  %v1372_v45 = vrot.slane %v2832_v63, 2  ;;  %v2053_v63 = vld [vmem:[%s3048_s2 + $0x1] ss:$0 sm:$0xff] }
 0x326   :  { %v1155_v51 = vsel %vm1153_vm7, %v1150_v61, %v1151_v44  ;;  %v1371_v23 = vrot.slane %v2822_v15, 2  ;;  %v1402_v7 = vsel %vm255_vm11, %v1378_v38, 0.0  ;;  %v1373_v6 = vrot.slane %v2834_v42, 2 }
 0x327   :  { %2206 = vmatmul.mubr.msk.bf16.gmra.mrb[12].mxu0 %vm337_vm0, %v1196_v52  ;;  %v1161_v4 = vsel %vm1153_vm7, %v1152_v2, %v1145_v19  ;;  %v1154_v29 = vsel %vm1153_vm7, %v1151_v44, %v1152_v2  ;;  %v1379_v57 = vsel %vm1374_vm10, %v1368_v43, %v1369_v26 }
 0x328   :  { %v1178_v13 = vsel %vm148_vm8, %v1161_v4, 0.0  ;;  %v1189_v5 = vpack.c.bf16 %v1154_v29, %v1155_v51  ;;  %v1376_v36 = vsel %vm1374_vm10, %v1371_v23, %v1372_v45  ;;  %v1408_v46 = vpack.c.bf16 %v1402_v7, %v1379_v57 }
 0x329   :  { %v1186_v27 = vpack.c.bf16 %v1160_v3, %v1178_v13  ;;  %v1377_v59 = vsel %vm1374_vm10, %v1370_v39, %v1371_v23  ;;  %v1382_v15 = vsel %vm1374_vm10, %v1373_v6, %v1366_v48  ;;  %v1375_v49 = vsel %vm1374_vm10, %v1372_v45, %v1373_v6 }
 0x32a   :  { %v1409_v16 = vpack.c.bf16 %v1376_v36, %v1377_v59  ;;  %v2925_v59 = vld [vmem:[#allocation2 + $0x18] sm:$0xff]  }
 0x32b   :  { %2211 = vmatprep.mubr.msk.bf16.mxu0 %vm337_vm0, %v1186_v27  ;;  %2239 = vmatprep.subr.bf16.mxu1 %v2925_v59 }
 0x32f   :  { %2212 = vmatmul.mubr.msk.bf16.vlgmr.msra.gmra.mrb[8].mxu0 %vm337_vm0, %v1187_v40 }
 0x330   :  { %2215 = vmatprep.mubr.msk.bf16.mxu0 %vm337_vm0, %v1188_v41  ;;  %2220 = vmatpush3.bf16.msra.mxu0 %v2336_v9  ;;  %v243_v9 = vadd.s32 2, %v97_v56 }
 0x332   :  { %vm259_vm12 = vcmp.lt.s32.totalorder %v243_v9, 32 }
 0x333   :  { %v1406_v56 = vsel %vm259_vm12, %v1382_v15, 0.0 }
 0x334   :  { %v1410_v60 = vpack.c.bf16 %v1406_v56, %v1375_v49 }
 0x337   :  { %2216 = vmatmul.mubr.msk.bf16.gmra.mrb[12].mxu0 %vm337_vm0, %v1189_v5 }
 0x338   :  { %2221 = vmatprep.mubr.msk.bf16.mxu0 %vm337_vm0, %v1407_v55 }
 0x33f   :  { %2222 = vmatmul.mubr.msk.bf16.vlgmr.msra.gmra.mrb[8].mxu0 %vm337_vm0, %v1408_v46 }
 0x340   :  { %2225 = vmatprep.mubr.msk.bf16.mxu0 %vm337_vm0, %v1409_v16 }
 0x347   :  { %2226 = vmatmul.mubr.msk.bf16.gmra.mrb[12].mxu0 %vm337_vm0, %v1410_v60 }
 0x412   :  { %v2223_v42 = vpop.f32.mrb[8].mxu0 }
 0x413   :  { %v2906_v22 = vadd.f32 %v2223_v42, %v2053_v63  ;;  %v1466_v11 = vpop.f32.mrb[9].mxu0 }
 0x414   :  { %v2908_v12 = vadd.f32 %v2053_v63, %v1466_v11  ;;  %v2224_v19 = vpop.f32.mrb[10].mxu0 }
 0x415   :  { %v2056_v2 = vmul.f32 -1.442695, %v2906_v22  ;;  %v2911_v52 = vadd.f32 %v2224_v19, %v2053_v63  ;;  %v1469_v58 = vpop.f32.mrb[11].mxu0 }
 0x416   :  { %v2054_v61 = vmul.f32 -1.442695, %v2908_v12  ;;  %v2914_v4 = vadd.f32 %v2053_v63, %v1469_v58 }
 0x417   :  { %2388 = vpow2.f32 %v2056_v2  ;;  %v2057_v17 = vmul.f32 -1.442695, %v2911_v52 }
 0x418   :  { %2390 = vpow2.f32 %v2054_v61  ;;  %v2055_v3 = vmul.f32 -1.442695, %v2914_v4 }
 0x419   :  { %2392 = vpow2.f32 %v2057_v17 }
 0x41a   :  { %v2227_v13 = vpop.f32.mrb[12].mxu0  ;;  %2394 = vpow2.f32 %v2055_v3 }
 0x41b   :  { %v2918_v14 = vadd.f32 %v2227_v13, %v2053_v63  ;;  %v1482_v27 = vpop.f32.mrb[13].mxu0 }
 0x41c   :  { %v1515_v28 = vadd.f32 %v2053_v63, %v1482_v27  ;;  %v2228_v30 = vpop.f32.mrb[14].mxu0 }
 0x41d   :  { %v2060_v33 = vmul.f32 -1.442695, %v2918_v14  ;;  %v2921_v34 = vadd.f32 %v2228_v30, %v2053_v63  ;;  %v1485_v40 = vpop.f32.mrb[15].mxu0 }
 0x41e   :  { %v2058_v41 = vmul.f32 -1.442695, %v1515_v28  ;;  %v1516_v43 = vadd.f32 %v2053_v63, %v1485_v40 }
 0x41f   :  { %2396 = vpow2.f32 %v2060_v33  ;;  %v2061_v44 = vmul.f32 -1.442695, %v2921_v34 }
 0x420   :  { %2398 = vpow2.f32 %v2058_v41  ;;  %v2059_v48 = vmul.f32 -1.442695, %v1516_v43 }
 0x421   :  { %v2389_v47 = vpop.eup %2388  ;;  %2400 = vpow2.f32 %v2061_v44 }
 0x422   :  { %v2391_v29 = vpop.eup %2390  ;;  %v1553_v39 = vadd.f32 1.0, %v2389_v47 }
 0x423   :  { %v1551_v32 = vadd.f32 1.0, %v2391_v29  ;;  %v2393_v50 = vpop.eup %2392 }
 0x424   :  { %v2395_v51 = vpop.eup %2394  ;;  %v1554_v5 = vadd.f32 1.0, %v2393_v50  ;;  %v2339_v50 = vld [vmem:[#allocation2 + $0x28] sm:$0xff]  }
 0x425   :  { %2402 = vrcp.f32 %v1551_v32  ;;  %v1552_v26 = vadd.f32 1.0, %v2395_v51 }
 0x426   :  { %2404 = vpow2.f32 %v2059_v48 }
 0x427   :  { %2406 = vrcp.f32 %v1553_v39 }
 0x428   :  { %2408 = vrcp.f32 %v1552_v26 }
 0x429   :  { %v2397_v54 = vpop.eup %2396  ;;  %2410 = vrcp.f32 %v1554_v5 }
 0x42a   :  { %v2399_v55 = vpop.eup %2398  ;;  %v1557_v45 = vadd.f32 1.0, %v2397_v54 }
 0x42b   :  { %v1555_v38 = vadd.f32 1.0, %v2399_v55  ;;  %v2401_v23 = vpop.eup %2400 }
 0x42c   :  { %v1558_v46 = vadd.f32 1.0, %v2401_v23 }
 0x42d   :  { %2412 = vrcp.f32 %v1555_v38 }
 0x42e   :  { %2414 = vrcp.f32 %v1557_v45 }
 0x42f   :  { %v2403_v7 = vpop.eup %2402 }
 0x430   :  { %v2405_v6 = vpop.eup %2404  ;;  %1583 = vrot.lane.b32.xlu0 %v2403_v7, %s2463_s29 }
 0x431   :  { %v1556_v36 = vadd.f32 1.0, %v2405_v6  ;;  %v2407_v9 = vpop.eup %2406 }
 0x432   :  { %v2409_v57 = vpop.eup %2408 }
 0x433   :  { %2416 = vrcp.f32 %v1556_v36  ;;  %1585 = vrot.lane.b32.xlu1 %v2409_v57, %s2463_s29  ;;  %v2411_v16 = vpop.eup %2410 }
 0x434   :  { %1587 = vrot.lane.b32.xlu0 %v2407_v9, %s2463_s29  ;;  %2418 = vrcp.f32 %v1558_v46 }
 0x435   :  { %2420 = vtanh.f32 %v2908_v12 }
 0x436   :  { %2422 = vtanh.f32 %v2906_v22 }
 0x437   :  { %v2413_v15 = vpop.eup %2412  ;;  %1589 = vrot.lane.b32.xlu1 %v2411_v16, %s2463_s29  ;;  %2424 = vtanh.f32 %v2914_v4 }
 0x438   :  { %1591 = vrot.lane.b32.xlu0 %v2413_v15, %s2463_s29  ;;  %v2415_v49 = vpop.eup %2414  ;;  %2426 = vtanh.f32 %v2911_v52 }
 0x439   :  { %2428 = vtanh.f32 %v1515_v28 }
 0x43a   :  { %2430 = vtanh.f32 %v2918_v14 }
 0x43b   :  { %2432 = vtanh.f32 %v1516_v43 }
 0x43c   :  { %1595 = vrot.lane.b32.xlu0 %v2415_v49, %s2463_s29  ;;  %2434 = vtanh.f32 %v2921_v34 }
 0x43d   :  { %v2417_v56 = vpop.eup %2416 }
 0x43e   :  { %1593 = vrot.lane.b32.xlu1 %v2417_v56, %s2463_s29  ;;  %v2419_v60 = vpop.eup %2418 }
 0x43f   :  { %v2421_v63 = vpop.eup %2420 }
 0x440   :  { %v2423_v11 = vpop.eup %2422 }
 0x441   :  { %v2425_v19 = vpop.eup %2424 }
 0x442   :  { %1597 = vrot.lane.b32.xlu1 %v2419_v60, %s2463_s29  ;;  %v2427_v17 = vpop.eup %2426 }
 0x443   :  { %v2429_v27 = vpop.eup %2428 }
 0x444   :  { %v2431_v51 = vpop.eup %2430 }
 0x445   :  { %v2433_v7 = vpop.eup %2432 }
 0x4a2   :  { %v1584_v62 = vpop.permute.xlu0 %1583 }
 0x4a3   :  { %v2940_v42 = vmul.f32 %v2421_v63, %v1584_v62 }
 0x4a5   :  { %v1586_v2 = vpop.permute.xlu1 %1585  ;;  %v1617_v22 = vrot.slane %v2940_v42, 7  ;;  %v1821_v14 = vrot.slane %v2940_v42, 1 }
 0x4a6   :  { %v1588_v58 = vpop.permute.xlu0 %1587  ;;  %v1608_v61 = vmul.f32 %v2425_v19, %v1586_v2 }
 0x4a7   :  { %v1609_v12 = vmul.f32 %v2423_v11, %v1588_v58  ;;  %v2435_v11 = vpop.eup %2434 }
 0x4a8   :  { %v1618_v4 = vrot.slane %v1608_v61, 7  ;;  %v1648_v52 = vpack.c.bf16 %v1608_v61, %v2940_v42  ;;  %v1822_v3 = vrot.slane %v1608_v61, 1 }
 0x4a9   :  { %v1619_v13 = vrot.slane %v1609_v12, 7  ;;  %v1823_v28 = vrot.slane %v1609_v12, 1  ;;  %v1590_v30 = vpop.permute.xlu1 %1589 }
 0x4aa   :  { %v1592_v33 = vpop.permute.xlu0 %1591  ;;  %v1610_v41 = vmul.f32 %v2427_v17, %v1590_v30  ;;  %2231 = vmatprep.mubr.msk.bf16.mxu1 %vm337_vm0, %v1648_v52  ;;  %v1631_v44 = vsel %vm285_vm1, %v1617_v22, %v1618_v4  ;;  %v1835_v47 = vsel %vm506_vm4, %v1821_v14, %v1822_v3 }
 0x4ab   :  { %v1630_v40 = vsel %vm285_vm1, %v1618_v4, %v1619_v13  ;;  %v1611_v43 = vmul.f32 %v2429_v27, %v1592_v33  ;;  %v1834_v34 = vsel %vm506_vm4, %v1822_v3, %v1823_v28 }
 0x4ac   :  { %v1620_v29 = vrot.slane %v1610_v41, 7  ;;  %v1649_v48 = vpack.c.bf16 %v1610_v41, %v1609_v12  ;;  %v1824_v32 = vrot.slane %v1610_v41, 1  ;;  %v1845_v54 = vpack.c.bf16 %v1834_v34, %v1835_v47 }
 0x4ad   :  { %v1621_v39 = vrot.slane %v1611_v43, 7  ;;  %v1825_v26 = vrot.slane %v1611_v43, 1 }
 0x4ae   :  { %v1596_v5 = vpop.permute.xlu0 %1595  ;;  %v1629_v55 = vsel %vm285_vm1, %v1619_v13, %v1620_v29  ;;  %v1833_v38 = vsel %vm506_vm4, %v1823_v28, %v1824_v32  ;;  %2232 = vmatmul.mubr.msk.bf16.vlgmr.msra.gmra.mrb[8].mxu1 %vm337_vm0, %v1649_v48 }
 0x4af   :  { %v1613_v45 = vmul.f32 %v2431_v51, %v1596_v5  ;;  %v1628_v23 = vsel %vm285_vm1, %v1620_v29, %v1621_v39  ;;  %v1642_v6 = vpack.c.bf16 %v1629_v55, %v1630_v40  ;;  %v1832_v36 = vsel %vm506_vm4, %v1824_v32, %v1825_v26  ;;  %2240 = vmatpush3.bf16.msra.mxu1 %v2925_v59 }
 0x4b0   :  { %v1594_v9 = vpop.permute.xlu1 %1593  ;;  %v1840_v57 = vsel %vm223_vm5, %v1832_v36, 0.0  ;;  %2249 = vmatprep.subr.bf16.mxu1 %v2339_v50  ;;  %v1637_v63 = vsel %vm184_vm3, %v1628_v23, 0.0 }
 0x4b1   :  { %v1612_v46 = vmul.f32 %v2433_v7, %v1594_v9  ;;  %v1623_v16 = vrot.slane %v1613_v45, 7  ;;  %v1827_v15 = vrot.slane %v1613_v45, 1  ;;  %v1846_v49 = vpack.c.bf16 %v1840_v57, %v1833_v38 }
 0x4b3   :  { %v1622_v56 = vrot.slane %v1612_v46, 7  ;;  %v1650_v60 = vpack.c.bf16 %v1612_v46, %v1611_v43  ;;  %v1826_v62 = vrot.slane %v1612_v46, 1 }
 0x4b4   :  { %v1598_v19 = vpop.permute.xlu1 %1597 }
 0x4b5   :  { %v1614_v2 = vmul.f32 %v2435_v11, %v1598_v19  ;;  %2235 = vmatprep.mubr.msk.bf16.mxu1 %vm337_vm0, %v1650_v60  ;;  %v1627_v53 = vsel %vm285_vm1, %v1621_v39, %v1622_v56  ;;  %v1626_v59 = vsel %vm285_vm1, %v1622_v56, %v1623_v16  ;;  %v1830_v58 = vsel %vm506_vm4, %v1826_v62, %v1827_v15 }
 0x4b6   :  { %v1643_v61 = vpack.c.bf16 %v1627_v53, %v1637_v63  ;;  %v1831_v12 = vsel %vm506_vm4, %v1825_v26, %v1826_v62 }
 0x4b7   :  { %v1624_v25 = vrot.slane %v1614_v2, 7  ;;  %v1651_v17 = vpack.c.bf16 %v1614_v2, %v1613_v45  ;;  %v1828_v4 = vrot.slane %v1614_v2, 1  ;;  %v1847_v52 = vpack.c.bf16 %v1830_v58, %v1831_v12 }
 0x4b9   :  { %2236 = vmatmul.mubr.msk.bf16.gmra.mrb[12].mxu1 %vm337_vm0, %v1651_v17  ;;  %v1632_v3 = vsel %vm285_vm1, %v1624_v25, %v1617_v22  ;;  %v1625_v13 = vsel %vm285_vm1, %v1623_v16, %v1624_v25  ;;  %v1829_v27 = vsel %vm506_vm4, %v1827_v15, %v1828_v4  ;;  %v1836_v28 = vsel %vm506_vm4, %v1828_v4, %v1821_v14 }
 0x4ba   :  { %v1633_v30 = vsel %vm180_vm2, %v1632_v3, 0.0  ;;  %v1644_v33 = vpack.c.bf16 %v1625_v13, %v1626_v59  ;;  %v1844_v40 = vsel %vm227_vm6, %v1836_v28, 0.0 }
 0x4bb   :  { %v1641_v42 = vpack.c.bf16 %v1631_v44, %v1633_v30  ;;  %v1848_v41 = vpack.c.bf16 %v1844_v40, %v1829_v27 }
 0x4bd   :  { %2241 = vmatprep.mubr.msk.bf16.mxu1 %vm337_vm0, %v1641_v42 }
 0x4c1   :  { %2242 = vmatmul.mubr.msk.bf16.vlgmr.msra.gmra.mrb[8].mxu1 %vm337_vm0, %v1642_v6 }
 0x4c2   :  { %2245 = vmatprep.mubr.msk.bf16.mxu1 %vm337_vm0, %v1643_v61  ;;  %2250 = vmatpush3.bf16.msra.mxu1 %v2339_v50 }
 0x4c9   :  { %2246 = vmatmul.mubr.msk.bf16.gmra.mrb[12].mxu1 %vm337_vm0, %v1644_v33 }
 0x4ca   :  { %2251 = vmatprep.mubr.msk.bf16.mxu1 %vm337_vm0, %v1845_v54 }
 0x4d1   :  { %2252 = vmatmul.mubr.msk.bf16.vlgmr.msra.gmra.mrb[8].mxu1 %vm337_vm0, %v1846_v49 }
 0x4d2   :  { %2255 = vmatprep.mubr.msk.bf16.mxu1 %vm337_vm0, %v1847_v52 }
 0x4d9   :  { %2256 = vmatmul.mubr.msk.bf16.gmra.mrb[12].mxu1 %vm337_vm0, %v1848_v41 }
 0x5a4   :  { %v2253_v10 = vpop.f32.mrb[8].mxu1 }
 0x5a5   :  { %v1951_v0 = vadd.f32 %v2253_v10, %v2078_v1  ;;  %v1904_v22 = vpop.f32.mrb[9].mxu1 }
 0x5a6   :  { %v1949_v14 = vadd.f32 %v2078_v1, %v1904_v22  ;;  %v2254_v43 = vpop.f32.mrb[10].mxu1 }
 0x5a7   :  { %v1959_v44 = vadd.f32 %v1951_v0, %v2776_v20  ;;  %v1952_v34 = vadd.f32 %v2254_v43, %v2078_v1  ;;  %v1907_v47 = vpop.f32.mrb[11].mxu1 }
 0x5a8   :  { %v1957_v29 = vadd.f32 %v1949_v14, %v2771_v8  ;;  %v1950_v48 = vadd.f32 %v2078_v1, %v1907_v47 }
 0x5a9   :  { %v1967_v32 = vmul.f32 0.70710677, %v1959_v44  ;;  %v1960_v39 = vadd.f32 %v1952_v34, %v2779_v21 }
 0x5aa   :  { %v1965_v50 = vmul.f32 0.70710677, %v1957_v29  ;;  %v1958_v51 = vadd.f32 %v1950_v48, %v2773_v18 }
 0x5ab   :  { %1976 = vst.msk [vmem:[%s3051_s5 + $0x10] sm:$0xff] %vm1973_vm13, %v1967_v32  ;;  %v1968_v26 = vmul.f32 0.70710677, %v1960_v39 }
 0x5ac   :  { %1974 = vst.msk [vmem:[%s3051_s5] sm:$0xff] %vm1973_vm13, %v1965_v50  ;;  %v1966_v20 = vmul.f32 0.70710677, %v1958_v51  ;;  %v2257_v8 = vpop.f32.mrb[12].mxu1 }
 0x5ad   :  { %1977 = vst.msk [vmem:[%s3051_s5 + $0x18] sm:$0xff] %vm1973_vm13, %v1968_v26  ;;  %v1955_v21 = vadd.f32 %v2257_v8, %v2078_v1  ;;  %v1920_v18 = vpop.f32.mrb[13].mxu1 }
 0x5ae   :  { %1975 = vst.msk [vmem:[%s3051_s5 + $0x8] sm:$0xff] %vm1973_vm13, %v1966_v20  ;;  %v1953_v5 = vadd.f32 %v2078_v1, %v1920_v18  ;;  %v2258_v54 = vpop.f32.mrb[14].mxu1 }
 0x5af   :  { %v1963_v55 = vadd.f32 %v1955_v21, %v2791_v37  ;;  %v1956_v38 = vadd.f32 %v2258_v54, %v2078_v1  ;;  %v1923_v45 = vpop.f32.mrb[15].mxu1 }
 0x5b0   :  { %v1961_v23 = vadd.f32 %v1953_v5, %v2785_v31  ;;  %v1954_v7 = vadd.f32 %v2078_v1, %v1923_v45 }
 0x5b1   :  { %v1971_v6 = vmul.f32 0.70710677, %v1963_v55  ;;  %v1964_v36 = vadd.f32 %v1956_v38, %v2794_v24 }
 0x5b2   :  { %v1969_v9 = vmul.f32 0.70710677, %v1961_v23  ;;  %v1962_v57 = vadd.f32 %v1954_v7, %v2788_v35 }
 0x5b3   :  { %1980 = vst.msk [vmem:[%s3051_s5 + $0x30] sm:$0xff] %vm1973_vm13, %v1971_v6  ;;  %v1972_v46 = vmul.f32 0.70710677, %v1964_v36 }
 0x5b4   :  { %1978 = vst.msk [vmem:[%s3051_s5 + $0x20] sm:$0xff] %vm1973_vm13, %v1969_v9  ;;  %v1970_v37 = vmul.f32 0.70710677, %v1962_v57 }
 0x5b5   :  { %1981 = vst.msk [vmem:[%s3051_s5 + $0x38] sm:$0xff] %vm1973_vm13, %v1972_v46 }
 0x5b6   :  { %1979 = vst.msk [vmem:[%s3051_s5 + $0x28] sm:$0xff] %vm1973_vm13, %v1970_v37 }
 0x5b7   :  { %1986 = vsyncpa [#allocation3], 1 }

</bundles_post_ra>
